<compile_context>
chip_gen: v7x
topology: tpu7x:2x2x1
jax: 0.10.0
libtpu: 0.0.40
codegen_flags: <defaults>
</compile_context>

<pallas_src>
import jax
import jax.numpy as jnp
from jax.experimental import pallas as pl
from jax.experimental.pallas import tpu as pltpu

SHIFT = float(jnp.log(2.0))
LANE = 128


def _softplus(x):
    # numerically stable softplus: max(x,0) + log1p(exp(-|x|))
    return jnp.maximum(x, 0.0) + jnp.log1p(jnp.exp(-jnp.abs(x)))


def _round_up(n, m):
    return ((n + m - 1) // m) * m


def _make_kernel(gather_mode, cnt_lane):
    """Builds the fused kernel. gather_mode: 'take' (dynamic VMEM row gather)
    or 'onehot' (one-hot matmul fallback)."""

    def kernel(node_ref, idx1_ref, idx2_ref, edge_ref,
               w_aw1_ref, w1_ref, b1_ref, w2_ref, b2_ref,
               w_aw2_ref, b_aw2_ref, w_aw3_ref, b_aw3_ref,
               out_ref,
               x_sc, acc_sc):
        i = pl.program_id(0)
        n_tiles = pl.num_programs(0)
        np_pad, dim_p = x_sc.shape      # padded node count / 128-padded feature dim

        # ---- one-time node stage: x = AtomWise1(node_fea), zero accumulator ----
        @pl.when(i == 0)
        def _init():
            x_sc[...] = jnp.dot(node_ref[...].astype(jnp.float32), w_aw1_ref[...],
                                preferred_element_type=jnp.float32)
            acc_sc[...] = jnp.zeros_like(acc_sc)

        # ---- FilterGenerator MLP on this edge tile (W stays in VMEM) ----
        # Biases are (1, dim_p) refs; the adds use the native sublane broadcast.
        e = edge_ref[...].astype(jnp.float32)
        h = jnp.dot(e, w1_ref[...], preferred_element_type=jnp.float32) + b1_ref[...]
        h = _softplus(h)                       # first "- log2" folded into b2 (wrapper)
        h = jnp.dot(h, w2_ref[...], preferred_element_type=jnp.float32) + b2_ref[...]
        w_filt = _softplus(h) - SHIFT          # (te, dim_p); padded lanes are exactly 0

        # ---- gather x[idx2] ----
        if gather_mode == "take":
            # Dynamic row gather from the VMEM-resident x (Mosaic sublane gather).
            # Padded edges carry idx2 = 0 (valid index); they are dropped by the
            # scatter matrix below, so the gathered garbage never contributes.
            idx2v = idx2_ref[...][:, 0]                               # (te,) int32
            xg = jnp.take(x_sc[...], idx2v, axis=0,
                          mode="promise_in_bounds")                    # (te, dim_p)
        else:
            # Fallback: one-hot matmul, but with a tiny (1, np_pad) node-id row
            # broadcast inside the compare (no (te, np_pad) iota materialized).
            node_row = jax.lax.broadcasted_iota(jnp.int32, (1, np_pad), 1)
            gmat = (idx2_ref[...] == node_row).astype(jnp.float32)     # (te, np_pad)
            xg = jnp.dot(gmat, x_sc[...], preferred_element_type=jnp.float32)

        cfconf = xg * w_filt                                           # (te, dim_p)

        # ---- fold the edge count into the scatter matmul ----
        # Lanes >= dim_v1 of cfconf are exactly zero (both xg and W padded lanes
        # are zero), so writing 1.0 into spare lane `cnt_lane` makes the scatter
        # matmul also produce per-node edge counts for free.
        lane_ids = jax.lax.broadcasted_iota(jnp.int32, (1, dim_p), 1)  # one vreg row
        cfconf = cfconf + (lane_ids == cnt_lane).astype(jnp.float32)

        # ---- scatter-add by idx1 via one-hot matmul on the MXU ----
        # Padded edges carry idx1 = -1 -> zero column -> no contribution (to the
        # feature sums nor to the count lane).
        node_col = jax.lax.broadcasted_iota(jnp.int32, (np_pad, 1), 0)  # tiny column
        smat = (node_col == idx1_ref[...]).astype(jnp.float32)          # (np_pad, te)
        acc_sc[...] += jnp.dot(smat, cfconf, preferred_element_type=jnp.float32)

        # ---- final node stage: mean, AtomWise2 -> softplus -> AtomWise3, residual ----
        @pl.when(i == n_tiles - 1)
        def _finalize():
            cnt = acc_sc[:, cnt_lane:cnt_lane + 1]                       # (np_pad, 1)
            inv = jnp.where(cnt > 0.0,
                            pl.reciprocal(jnp.maximum(cnt, 1.0), approx=True),
                            0.0)
            mean = acc_sc[...] * inv                                     # scatter_mean
            # (the ~1.0 left in the count lane hits a zero-padded row of w_aw2)
            n2 = (jnp.dot(mean, w_aw2_ref[...],
                          preferred_element_type=jnp.float32) + b_aw2_ref[...])
            n2 = _softplus(n2)                 # second "- log2" folded into b_aw3 (wrapper)
            n2 = (jnp.dot(n2, w_aw3_ref[...],
                          preferred_element_type=jnp.float32) + b_aw3_ref[...])
            out_ref[...] = (node_ref[...].astype(jnp.float32) + n2).astype(out_ref.dtype)

    return kernel


def interaction_block(node_fea, idx1, idx2, edge_fea, params, *,
                      edge_tile=1024, gather_mode="take"):
    """Fused SchNet InteractionBlock forward.

    node_fea: (n_nodes, dim_v1); edge_fea: (n_edges, dim_e0);
    idx1/idx2: (n_edges,) int node indices.
    params: dict with w_aw1, w1, b1, w2, b2, w_aw2, b_aw2, w_aw3, b_aw3
            (weights stored (in, out) i.e. transposed vs. nn.Linear).
    """
    n_nodes, dim_v1 = node_fea.shape
    n_edges, dim_e0 = edge_fea.shape
    dim_e1 = params["w1"].shape[1]
    assert dim_e1 == dim_v1, "x[idx2] * W requires dim_e1 == dim_v1"

    # Lane-dense padding: feature dims to 128 (+1 guarantees a spare count lane
    # even when dim_v1 is already a multiple of 128).
    dim_p = _round_up(dim_v1 + 1, LANE)
    dim_e0_p = _round_up(dim_e0, LANE)
    cnt_lane = dim_v1                     # first zero-padded lane holds the edge count
    np_pad = _round_up(n_nodes, 8)

    def pad_w(w, rows, cols):
        w = w.astype(jnp.float32)
        return jnp.zeros((rows, cols), jnp.float32).at[:w.shape[0], :w.shape[1]].set(w)

    def pad_b(b, cols):
        b = b.astype(jnp.float32)
        return jnp.zeros((1, cols), jnp.float32).at[0, :b.shape[0]].set(b)

    # Fold the "- log 2" shifts that feed a following Linear into its bias.
    # (Exact under zero padding: padded rows of w2 / w_aw3 are zero, so the
    #  spurious softplus(0)=log2 on padded lanes contributes nothing.)
    b2_fold = params["b2"] - SHIFT * jnp.sum(params["w2"], axis=0)
    b_aw3_fold = params["b_aw3"] - SHIFT * jnp.sum(params["w_aw3"], axis=0)

    w_aw1_p = pad_w(params["w_aw1"], dim_p, dim_p)
    w1_p = pad_w(params["w1"], dim_e0_p, dim_p)
    b1_p = pad_b(params["b1"], dim_p)
    w2_p = pad_w(params["w2"], dim_p, dim_p)
    b2_p = pad_b(b2_fold, dim_p)
    w_aw2_p = pad_w(params["w_aw2"], dim_p, dim_p)
    b_aw2_p = pad_b(params["b_aw2"], dim_p)
    w_aw3_p = pad_w(params["w_aw3"], dim_p, dim_p)
    b_aw3_p = pad_b(b_aw3_fold, dim_p)

    # Edge tiles: pad edges up to a whole number of tiles.  Padded edges use
    # sentinel idx1 = -1 (zero scatter column -> no contribution to sums or
    # counts) and idx2 = 0 (any in-range index is safe for the gather).
    if _round_up(n_edges, 8) <= edge_tile:
        te = max(_round_up(n_edges, 8), 8)    # single tile holds all edges
    else:
        te = _round_up(edge_tile, 128)        # multi-tile: idx1 lane dim must be 128-aligned
    ne_pad = _round_up(n_edges, te)
    n_tiles = max(ne_pad // te, 1)
    ne_pad = n_tiles * te

    node_p = jnp.zeros((np_pad, dim_p), node_fea.dtype).at[:n_nodes, :dim_v1].set(node_fea)
    edge_p = jnp.zeros((ne_pad, dim_e0_p), edge_fea.dtype).at[:n_edges, :dim_e0].set(edge_fea)
    idx1_p = jnp.full((1, ne_pad), -1, jnp.int32).at[0, :n_edges].set(idx1.astype(jnp.int32))
    idx2_p = jnp.zeros((ne_pad, 1), jnp.int32).at[:n_edges, 0].set(idx2.astype(jnp.int32))

    const = lambda i: (0, 0)  # grid-invariant blocks (weights, node arrays)

    out = pl.pallas_call(
        _make_kernel(gather_mode, cnt_lane),
        out_shape=jax.ShapeDtypeStruct((np_pad, dim_p), node_fea.dtype),
        grid_spec=pltpu.PrefetchScalarGridSpec(
            num_scalar_prefetch=0,
            grid=(n_tiles,),
            in_specs=[
                pl.BlockSpec((np_pad, dim_p), const),          # node_fea (full, resident)
                pl.BlockSpec((1, te), lambda i: (0, i)),       # idx1 (dest node per edge)
                pl.BlockSpec((te, 1), lambda i: (i, 0)),       # idx2 (source node per edge)
                pl.BlockSpec((te, dim_e0_p), lambda i: (i, 0)),  # edge_fea tile
                pl.BlockSpec((dim_p, dim_p), const),           # w_aw1
                pl.BlockSpec((dim_e0_p, dim_p), const),        # w1
                pl.BlockSpec((1, dim_p), const),               # b1
                pl.BlockSpec((dim_p, dim_p), const),           # w2
                pl.BlockSpec((1, dim_p), const),               # b2 (shift folded)
                pl.BlockSpec((dim_p, dim_p), const),           # w_aw2
                pl.BlockSpec((1, dim_p), const),               # b_aw2
                pl.BlockSpec((dim_p, dim_p), const),           # w_aw3
                pl.BlockSpec((1, dim_p), const),               # b_aw3 (shift folded)
            ],
            out_specs=pl.BlockSpec((np_pad, dim_p), const),
            scratch_shapes=[
                pltpu.VMEM((np_pad, dim_p), jnp.float32),      # x = AtomWise1(node_fea)
                pltpu.VMEM((np_pad, dim_p), jnp.float32),      # scatter sums + count lane
            ],
        ),
        # Edge axis carries the node accumulator -> must be "arbitrary".
        compiler_params=pltpu.CompilerParams(
            dimension_semantics=("arbitrary",),
            vmem_limit_bytes=48 * 1024 * 1024,   # explicit (v7x scoped default is 32 MiB)
        ),
    )(node_p, idx1_p, idx2_p, edge_p,
      w_aw1_p, w1_p, b1_p, w2_p, b2_p, w_aw2_p, b_aw2_p, w_aw3_p, b_aw3_p)

    return out[:n_nodes, :dim_v1]


def interaction_block_ref(node_fea, idx1, idx2, edge_fea, p):
    """Pure-JAX reference matching the PyTorch module."""
    x = node_fea @ p["w_aw1"]
    h = edge_fea @ p["w1"] + p["b1"]
    h = _softplus(h) - SHIFT
    h = h @ p["w2"] + p["b2"]
    w_filt = _softplus(h) - SHIFT
    cfconf = x[idx2] * w_filt
    n_nodes = node_fea.shape[0]
    num = jnp.zeros_like(node_fea).at[idx1].add(cfconf)
    cnt = jnp.zeros((n_nodes, 1), node_fea.dtype).at[idx1].add(1.0)
    mean = jnp.where(cnt > 0, num / jnp.maximum(cnt, 1.0), 0.0)   # scatter_mean into zeros
    n = mean @ p["w_aw2"] + p["b_aw2"]
    n = _softplus(n) - SHIFT
    n = n @ p["w_aw3"] + p["b_aw3"]
    return node_fea + n


if __name__ == "__main__":
    # Small shapes consistent with the module: 24 nodes with 32 features,
    # 100 edges with 16 raw edge features, hidden edge width 32 (== dim_v1).
    dim_v1, dim_e0, dim_e1 = 32, 16, 32
    n_nodes, n_edges = 24, 100           # 100 is not a tile multiple -> exercises padding

    key = jax.random.PRNGKey(0)
    keys = jax.random.split(key, 16)

    node_fea = jax.random.normal(keys[0], (n_nodes, dim_v1), jnp.float32)
    edge_fea = jax.random.normal(keys[1], (n_edges, dim_e0), jnp.float32)
    idx1 = jax.random.randint(keys[2], (n_edges,), 0, n_nodes, jnp.int32)
    idx2 = jax.random.randint(keys[3], (n_edges,), 0, n_nodes, jnp.int32)

    def linear_params(kw, kb, fan_in, fan_out, bias=True):
        # nn.Linear init; weight stored transposed -> (in, out).
        bound = 1.0 / float(jnp.sqrt(fan_in))
        w = jax.random.uniform(kw, (fan_in, fan_out), jnp.float32, -bound, bound)
        b = (jax.random.uniform(kb, (fan_out,), jnp.float32, -bound, bound)
             if bias else None)
        return w, b

    w_aw1, _ = linear_params(keys[4], keys[5], dim_v1, dim_v1, bias=False)
    w1, b1 = linear_params(keys[6], keys[7], dim_e0, dim_e1)
    w2, b2 = linear_params(keys[8], keys[9], dim_e1, dim_e1)
    w_aw2, b_aw2 = linear_params(keys[10], keys[11], dim_v1, dim_v1)
    w_aw3, b_aw3 = linear_params(keys[12], keys[13], dim_v1, dim_v1)

    params = dict(w_aw1=w_aw1, w1=w1, b1=b1, w2=w2, b2=b2,
                  w_aw2=w_aw2, b_aw2=b_aw2, w_aw3=w_aw3, b_aw3=b_aw3)

    ref = interaction_block_ref(node_fea, idx1, idx2, edge_fea, params)

    # Tolerance covers the exact-log2 bias folding rounding and the EUP
    # approximate reciprocal used for 1/cnt.
    ATOL = RTOL = 2e-3

    def run(mode):
        o = interaction_block(node_fea, idx1, idx2, edge_fea, params, gather_mode=mode)
        return jax.block_until_ready(o)

    # Prefer the dynamic VMEM row-gather path; if the installed Mosaic cannot
    # lower (or mis-lowers) the in-kernel jnp.take gather, fall back to the
    # proven one-hot-matmul gather so the kernel always runs.
    # TODO(synk): drop the fallback once the take-gather lowering is confirmed
    #             on the target jaxlib.
    out = None
    try:
        cand = run("take")
        if bool(jnp.allclose(cand, ref, atol=ATOL, rtol=RTOL)):
            out = cand
    except Exception:
        out = None
    if out is None:
        out = run("onehot")

    assert out.shape == (n_nodes, dim_v1)
    assert jnp.allclose(out, ref, atol=ATOL, rtol=RTOL), "mismatch vs reference"

    print("KERNEL_OK")
</pallas_src>

<mosaic_0001>
module attributes {stable_mosaic.version = 11 : i64} {
  func.func @kernel(%arg0: i32, %arg1: memref<24x128xf32, #tpu.memory_space<vmem>>, %arg2: memref<1x104xi32, #tpu.memory_space<vmem>>, %arg3: memref<104x1xi32, #tpu.memory_space<vmem>>, %arg4: memref<104x128xf32, #tpu.memory_space<vmem>>, %arg5: memref<128x128xf32, #tpu.memory_space<vmem>>, %arg6: memref<128x128xf32, #tpu.memory_space<vmem>>, %arg7: memref<1x128xf32, #tpu.memory_space<vmem>>, %arg8: memref<128x128xf32, #tpu.memory_space<vmem>>, %arg9: memref<1x128xf32, #tpu.memory_space<vmem>>, %arg10: memref<128x128xf32, #tpu.memory_space<vmem>>, %arg11: memref<1x128xf32, #tpu.memory_space<vmem>>, %arg12: memref<128x128xf32, #tpu.memory_space<vmem>>, %arg13: memref<1x128xf32, #tpu.memory_space<vmem>>, %arg14: memref<24x128xf32, #tpu.memory_space<vmem>>, %arg15: memref<24x128xf32, #tpu.memory_space<vmem>>, %arg16: memref<24x128xf32, #tpu.memory_space<vmem>>) attributes {dimension_semantics = [#tpu.dimension_semantics<arbitrary>], iteration_bounds = array<i64: 1>, scalar_prefetch = 0 : i64, scratch_operands = 2 : i64, tpu.core_type = #tpu.core_type<tc>, window_params = [{pipeline_mode = #tpu.pipeline_mode<synchronous>, transform_indices = @transform_0, window_bounds = array<i64: 24, 128>}, {transform_indices = @transform_1, window_bounds = array<i64: 1, 104>}, {transform_indices = @transform_2, window_bounds = array<i64: 104, 1>}, {transform_indices = @transform_3, window_bounds = array<i64: 104, 128>}, {pipeline_mode = #tpu.pipeline_mode<synchronous>, transform_indices = @transform_4, window_bounds = array<i64: 128, 128>}, {pipeline_mode = #tpu.pipeline_mode<synchronous>, transform_indices = @transform_5, window_bounds = array<i64: 128, 128>}, {pipeline_mode = #tpu.pipeline_mode<synchronous>, transform_indices = @transform_6, window_bounds = array<i64: 1, 128>}, {pipeline_mode = #tpu.pipeline_mode<synchronous>, transform_indices = @transform_7, window_bounds = array<i64: 128, 128>}, {pipeline_mode = #tpu.pipeline_mode<synchronous>, transform_indices = @transform_8, window_bounds = array<i64: 1, 128>}, {pipeline_mode = #tpu.pipeline_mode<synchronous>, transform_indices = @transform_9, window_bounds = array<i64: 128, 128>}, {pipeline_mode = #tpu.pipeline_mode<synchronous>, transform_indices = @transform_10, window_bounds = array<i64: 1, 128>}, {pipeline_mode = #tpu.pipeline_mode<synchronous>, transform_indices = @transform_11, window_bounds = array<i64: 128, 128>}, {pipeline_mode = #tpu.pipeline_mode<synchronous>, transform_indices = @transform_12, window_bounds = array<i64: 1, 128>}, {pipeline_mode = #tpu.pipeline_mode<synchronous>, transform_indices = @transform_13, window_bounds = array<i64: 24, 128>}]} {
    %c0_i32 = arith.constant 0 : i32
    %0 = arith.cmpi eq, %arg0, %c0_i32 : i32
    %1 = arith.extui %0 : i1 to i32
    %c0_i32_0 = arith.constant 0 : i32
    %2 = arith.cmpi ne, %1, %c0_i32_0 : i32
    scf.if %2 {
      %c0_30 = arith.constant 0 : index
      %c0_31 = arith.constant 0 : index
      %63 = vector.load %arg1[%c0_30, %c0_31] : memref<24x128xf32, #tpu.memory_space<vmem>>, vector<24x128xf32>
      %c0_32 = arith.constant 0 : index
      %c0_33 = arith.constant 0 : index
      %64 = vector.load %arg5[%c0_32, %c0_33] : memref<128x128xf32, #tpu.memory_space<vmem>>, vector<128x128xf32>
      %cst_34 = arith.constant dense<0.000000e+00> : vector<24x128xf32>
      %65 = tpu.matmul %63, %64, %cst_34 {dimension_numbers = #tpu.dot_dimension_numbers<[1], [0], [0], [1], [0, 0, 1, 1], [], []>} : vector<24x128xf32>, vector<128x128xf32>, vector<24x128xf32> -> vector<24x128xf32>
      %c0_35 = arith.constant 0 : index
      %c0_36 = arith.constant 0 : index
      %66 = vector.load %arg15[%c0_35, %c0_36] : memref<24x128xf32, #tpu.memory_space<vmem>>, vector<24x128xf32>
      tpu.vector_store %arg15[%c0_35, %c0_36], %65 {strides = array<i32>} : memref<24x128xf32, #tpu.memory_space<vmem>>, vector<24x128xf32>,
      %cst_37 = arith.constant 0.000000e+00 : f32
      %67 = vector.broadcast %cst_37 : f32 to vector<24x128xf32>
      %c0_38 = arith.constant 0 : index
      %c0_39 = arith.constant 0 : index
      %68 = vector.load %arg16[%c0_38, %c0_39] : memref<24x128xf32, #tpu.memory_space<vmem>>, vector<24x128xf32>
      tpu.vector_store %arg16[%c0_38, %c0_39], %67 {strides = array<i32>} : memref<24x128xf32, #tpu.memory_space<vmem>>, vector<24x128xf32>,
    } else {
    }
    %c0 = arith.constant 0 : index
    %c0_1 = arith.constant 0 : index
    %3 = vector.load %arg4[%c0, %c0_1] : memref<104x128xf32, #tpu.memory_space<vmem>>, vector<104x128xf32>
    %c0_2 = arith.constant 0 : index
    %c0_3 = arith.constant 0 : index
    %4 = vector.load %arg6[%c0_2, %c0_3] : memref<128x128xf32, #tpu.memory_space<vmem>>, vector<128x128xf32>
    %cst = arith.constant dense<0.000000e+00> : vector<104x128xf32>
    %5 = tpu.matmul %3, %4, %cst {dimension_numbers = #tpu.dot_dimension_numbers<[1], [0], [0], [1], [0, 0, 1, 1], [], []>} : vector<104x128xf32>, vector<128x128xf32>, vector<104x128xf32> -> vector<104x128xf32>
    %c0_4 = arith.constant 0 : index
    %c0_5 = arith.constant 0 : index
    %6 = vector.load %arg7[%c0_4, %c0_5] : memref<1x128xf32, #tpu.memory_space<vmem>>, vector<1x128xf32>
    %7 = vector.broadcast %6 : vector<1x128xf32> to vector<104x128xf32>
    %8 = arith.addf %5, %7 : vector<104x128xf32>
    %cst_6 = arith.constant 0.000000e+00 : f32
    %9 = vector.broadcast %cst_6 : f32 to vector<104x128xf32>
    %10 = arith.maximumf %8, %9 : vector<104x128xf32>
    %11 = math.absf %8 : vector<104x128xf32>
    %cst_7 = arith.constant 0.000000e+00 : f32
    %12 = vector.broadcast %cst_7 : f32 to vector<104x128xf32>
    %13 = arith.subf %12, %11 : vector<104x128xf32>
    %14 = math.exp %13 : vector<104x128xf32>
    %15 = math.log1p %14 : vector<104x128xf32>
    %16 = arith.addf %10, %15 : vector<104x128xf32>
    %c0_8 = arith.constant 0 : index
    %c0_9 = arith.constant 0 : index
    %17 = vector.load %arg8[%c0_8, %c0_9] : memref<128x128xf32, #tpu.memory_space<vmem>>, vector<128x128xf32>
    %cst_10 = arith.constant dense<0.000000e+00> : vector<104x128xf32>
    %18 = tpu.matmul %16, %17, %cst_10 {dimension_numbers = #tpu.dot_dimension_numbers<[1], [0], [0], [1], [0, 0, 1, 1], [], []>} : vector<104x128xf32>, vector<128x128xf32>, vector<104x128xf32> -> vector<104x128xf32>
    %c0_11 = arith.constant 0 : index
    %c0_12 = arith.constant 0 : index
    %19 = vector.load %arg9[%c0_11, %c0_12] : memref<1x128xf32, #tpu.memory_space<vmem>>, vector<1x128xf32>
    %20 = vector.broadcast %19 : vector<1x128xf32> to vector<104x128xf32>
    %21 = arith.addf %18, %20 : vector<104x128xf32>
    %cst_13 = arith.constant 0.000000e+00 : f32
    %22 = vector.broadcast %cst_13 : f32 to vector<104x128xf32>
    %23 = arith.maximumf %21, %22 : vector<104x128xf32>
    %24 = math.absf %21 : vector<104x128xf32>
    %cst_14 = arith.constant 0.000000e+00 : f32
    %25 = vector.broadcast %cst_14 : f32 to vector<104x128xf32>
    %26 = arith.subf %25, %24 : vector<104x128xf32>
    %27 = math.exp %26 : vector<104x128xf32>
    %28 = math.log1p %27 : vector<104x128xf32>
    %29 = arith.addf %23, %28 : vector<104x128xf32>
    %cst_15 = arith.constant 0.693147182 : f32
    %30 = vector.broadcast %cst_15 : f32 to vector<104x128xf32>
    %31 = arith.subf %29, %30 : vector<104x128xf32>
    %32 = tpu.iota {dimensions = array<i32: 1>} : vector<1x24xi32>
    %c0_16 = arith.constant 0 : index
    %c0_17 = arith.constant 0 : index
    %33 = vector.load %arg3[%c0_16, %c0_17] : memref<104x1xi32, #tpu.memory_space<vmem>>, vector<104x1xi32>
    %34 = vector.broadcast %33 : vector<104x1xi32> to vector<104x24xi32>
    %35 = vector.broadcast %32 : vector<1x24xi32> to vector<104x24xi32>
    %36 = arith.cmpi eq, %34, %35 : vector<104x24xi32>
    %37 = arith.extui %36 : vector<104x24xi1> to vector<104x24xi32>
    %38 = arith.sitofp %37 : vector<104x24xi32> to vector<104x24xf32>
    %c0_18 = arith.constant 0 : index
    %c0_19 = arith.constant 0 : index
    %39 = vector.load %arg15[%c0_18, %c0_19] : memref<24x128xf32, #tpu.memory_space<vmem>>, vector<24x128xf32>
    %cst_20 = arith.constant dense<0.000000e+00> : vector<104x128xf32>
    %40 = tpu.matmul %38, %39, %cst_20 {dimension_numbers = #tpu.dot_dimension_numbers<[1], [0], [0], [1], [0, 0, 1, 1], [], []>} : vector<104x24xf32>, vector<24x128xf32>, vector<104x128xf32> -> vector<104x128xf32>
    %41 = arith.mulf %40, %31 : vector<104x128xf32>
    %42 = tpu.iota {dimensions = array<i32: 1>} : vector<1x128xi32>
    %c32_i32 = arith.constant 32 : i32
    %43 = vector.broadcast %c32_i32 : i32 to vector<1x128xi32>
    %44 = arith.cmpi eq, %42, %43 : vector<1x128xi32>
    %45 = arith.extui %44 : vector<1x128xi1> to vector<1x128xi32>
    %46 = arith.sitofp %45 : vector<1x128xi32> to vector<1x128xf32>
    %47 = vector.broadcast %46 : vector<1x128xf32> to vector<104x128xf32>
    %48 = arith.addf %41, %47 : vector<104x128xf32>
    %49 = tpu.iota {dimensions = array<i32: 0>} : vector<24x1xi32>
    %c0_21 = arith.constant 0 : index
    %c0_22 = arith.constant 0 : index
    %50 = vector.load %arg2[%c0_21, %c0_22] : memref<1x104xi32, #tpu.memory_space<vmem>>, vector<1x104xi32>
    %51 = vector.broadcast %49 : vector<24x1xi32> to vector<24x104xi32>
    %52 = vector.broadcast %50 : vector<1x104xi32> to vector<24x104xi32>
    %53 = arith.cmpi eq, %51, %52 : vector<24x104xi32>
    %54 = arith.extui %53 : vector<24x104xi1> to vector<24x104xi32>
    %55 = arith.sitofp %54 : vector<24x104xi32> to vector<24x104xf32>
    %c0_23 = arith.constant 0 : index
    %c0_24 = arith.constant 0 : index
    %56 = vector.load %arg16[%c0_23, %c0_24] : memref<24x128xf32, #tpu.memory_space<vmem>>, vector<24x128xf32>
    %cst_25 = arith.constant dense<0.000000e+00> : vector<24x128xf32>
    %57 = tpu.matmul %55, %48, %cst_25 {dimension_numbers = #tpu.dot_dimension_numbers<[1], [0], [0], [1], [0, 0, 1, 1], [], []>} : vector<24x104xf32>, vector<104x128xf32>, vector<24x128xf32> -> vector<24x128xf32>
    %58 = arith.addf %56, %57 : vector<24x128xf32>
    %c0_26 = arith.constant 0 : index
    %c0_27 = arith.constant 0 : index
    %59 = vector.load %arg16[%c0_26, %c0_27] : memref<24x128xf32, #tpu.memory_space<vmem>>, vector<24x128xf32>
    tpu.vector_store %arg16[%c0_26, %c0_27], %58 {strides = array<i32>} : memref<24x128xf32, #tpu.memory_space<vmem>>, vector<24x128xf32>,
    %c0_i32_28 = arith.constant 0 : i32
    %60 = arith.cmpi eq, %arg0, %c0_i32_28 : i32
    %61 = arith.extui %60 : i1 to i32
    %c0_i32_29 = arith.constant 0 : i32
    %62 = arith.cmpi ne, %61, %c0_i32_29 : i32
    scf.if %62 {
      %c0_30 = arith.constant 0 : index
      %c32 = arith.constant 32 : index
      %63 = vector.load %arg16[%c0_30, %c32] : memref<24x128xf32, #tpu.memory_space<vmem>>, vector<24x1xf32>
      %cst_31 = arith.constant 0.000000e+00 : f32
      %64 = vector.broadcast %cst_31 : f32 to vector<24x1xf32>
      %65 = arith.cmpf ogt, %63, %64 : vector<24x1xf32>
      %cst_32 = arith.constant 1.000000e+00 : f32
      %66 = vector.broadcast %cst_32 : f32 to vector<24x1xf32>
      %67 = arith.maximumf %63, %66 : vector<24x1xf32>
      %68 = tpu.reciprocal %67 {approx = true} : vector<24x1xf32> -> vector<24x1xf32>
      %cst_33 = arith.constant 0.000000e+00 : f32
      %69 = vector.broadcast %cst_33 : f32 to vector<24x1xf32>
      %70 = arith.select %65, %68, %69 : vector<24x1xi1>, vector<24x1xf32>
      %c0_34 = arith.constant 0 : index
      %c0_35 = arith.constant 0 : index
      %71 = vector.load %arg16[%c0_34, %c0_35] : memref<24x128xf32, #tpu.memory_space<vmem>>, vector<24x128xf32>
      %72 = vector.broadcast %70 : vector<24x1xf32> to vector<24x128xf32>
      %73 = arith.mulf %71, %72 : vector<24x128xf32>
      %c0_36 = arith.constant 0 : index
      %c0_37 = arith.constant 0 : index
      %74 = vector.load %arg10[%c0_36, %c0_37] : memref<128x128xf32, #tpu.memory_space<vmem>>, vector<128x128xf32>
      %cst_38 = arith.constant dense<0.000000e+00> : vector<24x128xf32>
      %75 = tpu.matmul %73, %74, %cst_38 {dimension_numbers = #tpu.dot_dimension_numbers<[1], [0], [0], [1], [0, 0, 1, 1], [], []>} : vector<24x128xf32>, vector<128x128xf32>, vector<24x128xf32> -> vector<24x128xf32>
      %c0_39 = arith.constant 0 : index
      %c0_40 = arith.constant 0 : index
      %76 = vector.load %arg11[%c0_39, %c0_40] : memref<1x128xf32, #tpu.memory_space<vmem>>, vector<1x128xf32>
      %77 = vector.broadcast %76 : vector<1x128xf32> to vector<24x128xf32>
      %78 = arith.addf %75, %77 : vector<24x128xf32>
      %cst_41 = arith.constant 0.000000e+00 : f32
      %79 = vector.broadcast %cst_41 : f32 to vector<24x128xf32>
      %80 = arith.maximumf %78, %79 : vector<24x128xf32>
      %81 = math.absf %78 : vector<24x128xf32>
      %cst_42 = arith.constant 0.000000e+00 : f32
      %82 = vector.broadcast %cst_42 : f32 to vector<24x128xf32>
      %83 = arith.subf %82, %81 : vector<24x128xf32>
      %84 = math.exp %83 : vector<24x128xf32>
      %85 = math.log1p %84 : vector<24x128xf32>
      %86 = arith.addf %80, %85 : vector<24x128xf32>
      %c0_43 = arith.constant 0 : index
      %c0_44 = arith.constant 0 : index
      %87 = vector.load %arg12[%c0_43, %c0_44] : memref<128x128xf32, #tpu.memory_space<vmem>>, vector<128x128xf32>
      %cst_45 = arith.constant dense<0.000000e+00> : vector<24x128xf32>
      %88 = tpu.matmul %86, %87, %cst_45 {dimension_numbers = #tpu.dot_dimension_numbers<[1], [0], [0], [1], [0, 0, 1, 1], [], []>} : vector<24x128xf32>, vector<128x128xf32>, vector<24x128xf32> -> vector<24x128xf32>
      %c0_46 = arith.constant 0 : index
      %c0_47 = arith.constant 0 : index
      %89 = vector.load %arg13[%c0_46, %c0_47] : memref<1x128xf32, #tpu.memory_space<vmem>>, vector<1x128xf32>
      %90 = vector.broadcast %89 : vector<1x128xf32> to vector<24x128xf32>
      %91 = arith.addf %88, %90 : vector<24x128xf32>
      %c0_48 = arith.constant 0 : index
      %c0_49 = arith.constant 0 : index
      %92 = vector.load %arg1[%c0_48, %c0_49] : memref<24x128xf32, #tpu.memory_space<vmem>>, vector<24x128xf32>
      %93 = arith.addf %92, %91 : vector<24x128xf32>
      %c0_50 = arith.constant 0 : index
      %c0_51 = arith.constant 0 : index
      %94 = vector.load %arg14[%c0_50, %c0_51] : memref<24x128xf32, #tpu.memory_space<vmem>>, vector<24x128xf32>
      tpu.vector_store %arg14[%c0_50, %c0_51], %93 {strides = array<i32>} : memref<24x128xf32, #tpu.memory_space<vmem>>, vector<24x128xf32>,
    } else {
    }
    return
  }
  func.func @transform_0(%arg0: i32) -> (i32, i32) {
    %c0_i32 = arith.constant 0 : i32
    %c0_i32_0 = arith.constant 0 : i32
    %c0_i32_1 = arith.constant 0 : i32
    return %c0_i32, %c0_i32_0 : i32, i32
  }
  func.func @transform_1(%arg0: i32) -> (i32, i32) {
    %c0_i32 = arith.constant 0 : i32
    %c0_i32_0 = arith.constant 0 : i32
    return %c0_i32, %arg0 : i32, i32
  }
  func.func @transform_2(%arg0: i32) -> (i32, i32) {
    %c0_i32 = arith.constant 0 : i32
    %c0_i32_0 = arith.constant 0 : i32
    return %arg0, %c0_i32 : i32, i32
  }
  func.func @transform_3(%arg0: i32) -> (i32, i32) {
    %c0_i32 = arith.constant 0 : i32
    %c0_i32_0 = arith.constant 0 : i32
    return %arg0, %c0_i32 : i32, i32
  }
  func.func @transform_4(%arg0: i32) -> (i32, i32) {
    %c0_i32 = arith.constant 0 : i32
    %c0_i32_0 = arith.constant 0 : i32
    %c0_i32_1 = arith.constant 0 : i32
    return %c0_i32, %c0_i32_0 : i32, i32
  }
  func.func @transform_5(%arg0: i32) -> (i32, i32) {
    %c0_i32 = arith.constant 0 : i32
    %c0_i32_0 = arith.constant 0 : i32
    %c0_i32_1 = arith.constant 0 : i32
    return %c0_i32, %c0_i32_0 : i32, i32
  }
  func.func @transform_6(%arg0: i32) -> (i32, i32) {
    %c0_i32 = arith.constant 0 : i32
    %c0_i32_0 = arith.constant 0 : i32
    %c0_i32_1 = arith.constant 0 : i32
    return %c0_i32, %c0_i32_0 : i32, i32
  }
  func.func @transform_7(%arg0: i32) -> (i32, i32) {
    %c0_i32 = arith.constant 0 : i32
    %c0_i32_0 = arith.constant 0 : i32
    %c0_i32_1 = arith.constant 0 : i32
    return %c0_i32, %c0_i32_0 : i32, i32
  }
  func.func @transform_8(%arg0: i32) -> (i32, i32) {
    %c0_i32 = arith.constant 0 : i32
    %c0_i32_0 = arith.constant 0 : i32
    %c0_i32_1 = arith.constant 0 : i32
    return %c0_i32, %c0_i32_0 : i32, i32
  }
  func.func @transform_9(%arg0: i32) -> (i32, i32) {
    %c0_i32 = arith.constant 0 : i32
    %c0_i32_0 = arith.constant 0 : i32
    %c0_i32_1 = arith.constant 0 : i32
    return %c0_i32, %c0_i32_0 : i32, i32
  }
  func.func @transform_10(%arg0: i32) -> (i32, i32) {
    %c0_i32 = arith.constant 0 : i32
    %c0_i32_0 = arith.constant 0 : i32
    %c0_i32_1 = arith.constant 0 : i32
    return %c0_i32, %c0_i32_0 : i32, i32
  }
  func.func @transform_11(%arg0: i32) -> (i32, i32) {
    %c0_i32 = arith.constant 0 : i32
    %c0_i32_0 = arith.constant 0 : i32
    %c0_i32_1 = arith.constant 0 : i32
    return %c0_i32, %c0_i32_0 : i32, i32
  }
  func.func @transform_12(%arg0: i32) -> (i32, i32) {
    %c0_i32 = arith.constant 0 : i32
    %c0_i32_0 = arith.constant 0 : i32
    %c0_i32_1 = arith.constant 0 : i32
    return %c0_i32, %c0_i32_0 : i32, i32
  }
  func.func @transform_13(%arg0: i32) -> (i32, i32) {
    %c0_i32 = arith.constant 0 : i32
    %c0_i32_0 = arith.constant 0 : i32
    %c0_i32_1 = arith.constant 0 : i32
    return %c0_i32, %c0_i32_0 : i32, i32
  }
}

</mosaic_0001>

<bundles_post_ra>
// kernel: tpu_custom_call.1
= control target key start
LH: loop header
LB: loop body
LE: loop exit
PB: predicated region body
PF: predicated region fallthrough
CT: control target
= control target key end

     0   :  { %18 = vsyncpa [#allocation5], 0  ;;  %s3558_s0 = inlined_call_operand.hbm [shape: f32[24,128], index: 0, kind: input, shape index: {}]   ;;  %s3559_s1 = inlined_call_operand.vmem [shape: s32[1,104], index: 1, kind: input, shape index: {}]   ;;  %s3560_s2 = inlined_call_operand.vmem [shape: s32[104,1], index: 2, kind: input, shape index: {}]   ;;  %s3561_s3 = inlined_call_operand.hbm [shape: f32[104,128], index: 3, kind: input, shape index: {}]   ;;  %s3562_s4 = inlined_call_operand.hbm [shape: f32[128,128], index: 4, kind: input, shape index: {}]   ;;  %s3563_s5 = inlined_call_operand.hbm [shape: f32[128,128], index: 5, kind: input, shape index: {}]   ;;  %s3564_s6 = inlined_call_operand.vmem [shape: f32[1,128], index: 6, kind: input, shape index: {}]   ;;  %s3565_s7 = inlined_call_operand.vmem [shape: f32[128,128], index: 7, kind: input, shape index: {}]   ;;  %s3566_s8 = inlined_call_operand.vmem [shape: f32[1,128], index: 8, kind: input, shape index: {}]   ;;  %s3567_s9 = inlined_call_operand.hbm [shape: f32[128,128], index: 9, kind: input, shape index: {}]   ;;  %s3568_s10 = inlined_call_operand.vmem [shape: f32[1,128], index: 10, kind: input, shape index: {}]   ;;  %s3569_s11 = inlined_call_operand.hbm [shape: f32[128,128], index: 11, kind: input, shape index: {}]   ;;  %s3570_s12 = inlined_call_operand.vmem [shape: f32[1,128], index: 12, kind: input, shape index: {}]   ;;  %s3571_s13 = inlined_call_operand.hbm [shape: f32[24,128], index: 13, kind: output, shape index: {}]  }
   0x1   :  { %19 = vsyncpa [#allocation8], 0 }
   0x2   :  { %20 = vsyncpa [#allocation11], 0 }
   0x3   :  { %21 = vsyncpa [#allocation14], 0 }
   0x4   :  { %22 = vsyncpa [#allocation6], 0  ;;  %s2690_s25 = smov [#allocation7]   ;;  %s2691_s27 = smov [#allocation10]  }
   0x5   :  { %s44_s26 = sshll.u32 %s2690_s25, 4  ;;  %s68_s28 = sshll.u32 %s2691_s27, 4  ;;  %s45_s26 = int_to_ptr.vmem [resolvable:$true] %s44_s26  ;;  %s2774_s28 = int_to_ptr.vmem [resolvable:$true] %s68_s28 }
   0x6   :  { %s2526_s14 = scalar_lea.hbm %s3561_s3, 1664 }
   0x7   :  { %p2527_p0 = scmp.ne.s32.totalorder %s3561_s3, %s2526_s14  ;;  %p2530_p1 = scmp.lt.u32.totalorder %s2526_s14, %s3561_s3 }
   0x9   :  { %p2532_p2 = pnand %p2530_p1, %p2527_p0 }
   0xb   :  { %2535 = shalt.err (!%p2532_p2)
}
   0xc   :  { %s2536_s19 = scalar_lea.vmem %s45_s26, 1664  ;;  %p2541_p4 = scmp.lt.s32.totalorder %s45_s26, %s45_s26 }
   0xd   :  { %p2537_p3 = scmp.ne.s32.totalorder %s45_s26, %s2536_s19  ;;  %p2542_p5 = scmp.lt.s32.totalorder %s2536_s19, %s2536_s19 }
   0xf   :  { %p2543_p6 = por %p2542_p5, %p2541_p4 }
  0x11   :  { %p2544_p7 = pnand %p2543_p6, %p2537_p3 }
  0x13   :  { %2547 = shalt.err (!%p2544_p7)
}
  0x14   :  { %s2692_s20 = smov 128   ;;  %s2693_s21 = smov 8  }
  0x15   :  { %50 = dma.hbm_to_vmem [thread:$0]  %s3561_s3, 1664, %s45_s26, [#allocation8], %s2692_s20, %s2692_s20, %s2693_s21  }
  0x16   :  { %s2548_s27 = scalar_lea.hbm %s3563_s5, 2048 }
  0x17   :  { %p2549_p8 = scmp.ne.s32.totalorder %s3563_s5, %s2548_s27  ;;  %p2552_p9 = scmp.lt.u32.totalorder %s2548_s27, %s3563_s5 }
  0x19   :  { %p2554_p10 = pnand %p2552_p9, %p2549_p8 }
  0x1b   :  { %2557 = shalt.err (!%p2554_p10)
}
  0x1c   :  { %s2558_s16 = scalar_lea.vmem %s2774_s28, 2048  ;;  %p2563_p12 = scmp.lt.s32.totalorder %s2774_s28, %s2774_s28 }
  0x1d   :  { %p2559_p11 = scmp.ne.s32.totalorder %s2774_s28, %s2558_s16  ;;  %p2564_p13 = scmp.lt.s32.totalorder %s2558_s16, %s2558_s16 }
  0x1f   :  { %p2565_p0 = por %p2564_p13, %p2563_p12 }
  0x21   :  { %p2566_p1 = pnand %p2565_p0, %p2559_p11 }
  0x23   :  { %2569 = shalt.err (!%p2566_p1)
}
  0x24   :  { %74 = dma.hbm_to_vmem [thread:$0]  %s3563_s5, 2048, %s2774_s28, [#allocation11], %s2692_s20, %s2692_s20, %s2693_s21  }
  0x25   :  { %s2694_s17 = smov [#allocation4]   ;;  %s2695_s19 = smov [#allocation9]  }
  0x26   :  { %s28_s18 = sshll.u32 %s2694_s17, 4  ;;  %s56_s22 = sshll.u32 %s2695_s19, 4  ;;  %s29_s18 = int_to_ptr.vmem [resolvable:$true] %s28_s18  ;;  %s2811_s22 = int_to_ptr.vmem [resolvable:$true] %s56_s22 }
  0x27   :  { %s2570_s25 = scalar_lea.hbm %s3558_s0, 384 }
  0x28   :  { %p2571_p2 = scmp.ne.s32.totalorder %s3558_s0, %s2570_s25  ;;  %p2574_p3 = scmp.lt.u32.totalorder %s2570_s25, %s3558_s0 }
  0x2a   :  { %p2576_p4 = pnand %p2574_p3, %p2571_p2 }
  0x2c   :  { %2579 = shalt.err (!%p2576_p4)
}
  0x2d   :  { %s2580_s5 = scalar_lea.vmem %s29_s18, 384  ;;  %p2585_p6 = scmp.lt.s32.totalorder %s29_s18, %s29_s18 }
  0x2e   :  { %p2581_p5 = scmp.ne.s32.totalorder %s29_s18, %s2580_s5  ;;  %p2586_p7 = scmp.lt.s32.totalorder %s2580_s5, %s2580_s5 }
  0x30   :  { %p2587_p8 = por %p2586_p7, %p2585_p6 }
  0x32   :  { %p2588_p9 = pnand %p2587_p8, %p2581_p5 }
  0x34   :  { %2591 = shalt.err (!%p2588_p9)
}
  0x35   :  { %34 = dma.hbm_to_vmem [thread:$0]  %s3558_s0, 384, %s29_s18, [#allocation5], %s2692_s20, %s2692_s20, %s2693_s21  }
  0x36   :  { %s2592_s26 = scalar_lea.hbm %s3562_s4, 2048 }
  0x37   :  { %p2593_p10 = scmp.ne.s32.totalorder %s3562_s4, %s2592_s26  ;;  %p2596_p11 = scmp.lt.u32.totalorder %s2592_s26, %s3562_s4 }
  0x39   :  { %p2598_p12 = pnand %p2596_p11, %p2593_p10 }
  0x3b   :  { %2601 = shalt.err (!%p2598_p12)
}
  0x3c   :  { %s2602_s25 = scalar_lea.vmem %s2811_s22, 2048  ;;  %p2607_p0 = scmp.lt.s32.totalorder %s2811_s22, %s2811_s22 }
  0x3d   :  { %p2603_p13 = scmp.ne.s32.totalorder %s2811_s22, %s2602_s25  ;;  %p2608_p1 = scmp.lt.s32.totalorder %s2602_s25, %s2602_s25 }
  0x3f   :  { %p2609_p2 = por %p2608_p1, %p2607_p0 }
  0x41   :  { %p2610_p3 = pnand %p2609_p2, %p2603_p13 }
  0x43   :  { %2613 = shalt.err (!%p2610_p3)
}
  0x44   :  { %62 = dma.hbm_to_vmem [thread:$0]  %s3562_s4, 2048, %s2811_s22, [#allocation8], %s2692_s20, %s2692_s20, %s2693_s21  }
  0x45   :  { %s2696_s27 = smov [#allocation12]   ;;  %s2697_s30 = smov [#allocation13]  }
  0x46   :  { %s86_s29 = sshll.u32 %s2696_s27, 4  ;;  %s100_s14 = sshll.u32 %s2697_s30, 4  ;;  %s87_s29 = int_to_ptr.vmem [resolvable:$true] %s86_s29  ;;  %s2848_s14 = int_to_ptr.vmem [resolvable:$true] %s100_s14 }
  0x47   :  { %s2614_s15 = scalar_lea.hbm %s3567_s9, 2048 }
  0x48   :  { %p2615_p4 = scmp.ne.s32.totalorder %s3567_s9, %s2614_s15  ;;  %p2618_p5 = scmp.lt.u32.totalorder %s2614_s15, %s3567_s9 }
  0x4a   :  { %p2620_p6 = pnand %p2618_p5, %p2615_p4 }
  0x4c   :  { %2623 = shalt.err (!%p2620_p6)
}
  0x4d   :  { %s2624_s4 = scalar_lea.vmem %s87_s29, 2048  ;;  %p2629_p8 = scmp.lt.s32.totalorder %s87_s29, %s87_s29 }
  0x4e   :  { %p2625_p7 = scmp.ne.s32.totalorder %s87_s29, %s2624_s4  ;;  %p2630_p9 = scmp.lt.s32.totalorder %s2624_s4, %s2624_s4 }
  0x50   :  { %p2631_p10 = por %p2630_p9, %p2629_p8 }
  0x52   :  { %p2632_p11 = pnand %p2631_p10, %p2625_p7 }
  0x54   :  { %2635 = shalt.err (!%p2632_p11)
}
  0x55   :  { %92 = dma.hbm_to_vmem [thread:$0]  %s3567_s9, 2048, %s87_s29, [#allocation11], %s2692_s20, %s2692_s20, %s2693_s21  }
  0x56   :  { %s2636_s25 = scalar_lea.hbm %s3569_s11, 2048 }
  0x57   :  { %p2637_p12 = scmp.ne.s32.totalorder %s3569_s11, %s2636_s25  ;;  %p2640_p13 = scmp.lt.u32.totalorder %s2636_s25, %s3569_s11 }
  0x59   :  { %p2642_p0 = pnand %p2640_p13, %p2637_p12 }
  0x5b   :  { %2645 = shalt.err (!%p2642_p0)
}
  0x5c   :  { %s2646_s5 = scalar_lea.vmem %s2848_s14, 2048  ;;  %p2651_p2 = scmp.lt.s32.totalorder %s2848_s14, %s2848_s14 }
  0x5d   :  { %p2647_p1 = scmp.ne.s32.totalorder %s2848_s14, %s2646_s5  ;;  %p2652_p3 = scmp.lt.s32.totalorder %s2646_s5, %s2646_s5 }
  0x5f   :  { %p2653_p4 = por %p2652_p3, %p2651_p2 }
  0x61   :  { %p2654_p5 = pnand %p2653_p4, %p2647_p1 }
  0x63   :  { %2657 = shalt.err (!%p2654_p5)
}
  0x64   :  { %106 = dma.hbm_to_vmem [thread:$0]  %s3569_s11, 2048, %s2848_s14, [#allocation14], %s2692_s20, %s2692_s20, %s2693_s21  }
  0x65   :  { %2680 = dma.done.wait [#allocation5], 384  }
  0x66   :  { %2681 = vsyncadd [#allocation5], 4294966912 }
  0x67   :  { %2682 = dma.done.wait [#allocation8], 3712  }
  0x68   :  { %2683 = vsyncadd [#allocation8], 4294963584 }
  0x69   :  { %2684 = dma.done.wait [#allocation11], 4096  }
  0x6a   :  { %2685 = vsyncadd [#allocation11], 4294963200 }
  0x6b   :  { %2686 = dma.done.wait [#allocation14], 2048  }
  0x6c   :  { %2687 = vsyncadd [#allocation14], 4294965248  ;;  %v2698_v0 = vmov 0.0|0.0   ;;  %vm2699_vm0 = vmmov 0   ;;  %v2700_v1 = vmov 0.0   ;;  %v2701_v2 = vmov 0  }
  0x6d   :  { %2253 = vmatprep.subr.bf16.mxu1 %v2698_v0  ;;  %1957 = vmatprep.mubr.msk.f32.mxu1 %vm2699_vm0, %v2700_v1  ;;  %v249_v3 = vld [vmem:[#allocation10] sm:$0xff]  ;;  %v250_v4 = vld [vmem:[#allocation10 + $0x8] sm:$0xff]  ;;  %v251_v5 = vld [vmem:[#allocation10 + $0x10] sm:$0xff]  ;;  %vm1054_vm15 = vcmask 195584   ;;  %s2703_s9 = smov [#allocation15]  }
  0x6e   :  { %2229 = vmatprep.subr.bf16.mxu0 %v2698_v0  ;;  %1916 = vmatprep.mubr.msk.f32.mxu0 %vm2699_vm0, %v2700_v1  ;;  %v2254_v6 = vpack.c.bf16 %v250_v4, %v249_v3  ;;  %v252_v7 = vld [vmem:[#allocation10 + $0x18] sm:$0xff]  ;;  %v253_v9 = vld [vmem:[#allocation10 + $0x20] sm:$0xff]  ;;  %v254_v10 = vld [vmem:[#allocation10 + $0x28] sm:$0xff]  ;;  %s1671_s29 = sshll.u32 %s2703_s9, 4  ;;  %s1672_s29 = int_to_ptr.vmem [resolvable:$true] %s1671_s29 }
  0x6f   :  { %2400 = vset.pattern.permute.xlu0 %v2701_v2  ;;  %2401 = vset.pattern.permute.xlu1 %v2701_v2  ;;  %v2257_v8 = vpack.c.bf16 %v252_v7, %v251_v5  ;;  %v2260_v11 = vpack.c.bf16 %v254_v10, %v253_v9  ;;  %v255_v12 = vld [vmem:[#allocation10 + $0x30] sm:$0xff]  ;;  %v256_v13 = vld [vmem:[#allocation10 + $0x38] sm:$0xff]  ;;  %v134_v14 = vld [vmem:[#allocation9] sm:$0xff]  ;;  %p2663_p7 = scmp.lt.s32.totalorder %s1672_s29, %s1672_s29 }
  0x70   :  { %2255 = vmatpush3.bf16.msra.mxu1 %v2254_v6  ;;  %v135_v15 = vld [vmem:[#allocation9 + $0x8] sm:$0xff]  ;;  %v136_v17 = vld [vmem:[#allocation9 + $0x10] sm:$0xff]  ;;  %v137_v18 = vld [vmem:[#allocation9 + $0x18] sm:$0xff]  ;;  %v2263_v19 = vpack.c.bf16 %v256_v13, %v255_v12 }
  0x71   :  { %2256 = vmatprep.subr.bf16.mxu1 %v2698_v0  ;;  %v2230_v16 = vpack.c.bf16 %v135_v15, %v134_v14  ;;  %v257_v20 = vld [vmem:[#allocation10 + $0x40] sm:$0xff]  ;;  %v258_v21 = vld [vmem:[#allocation10 + $0x48] sm:$0xff]  ;;  %v2233_v22 = vpack.c.bf16 %v137_v18, %v136_v17  ;;  %v259_v26 = vld [vmem:[#allocation10 + $0x50] sm:$0xff] }
  0x72   :  { %v138_v23 = vld [vmem:[#allocation9 + $0x20] sm:$0xff]  ;;  %v139_v24 = vld [vmem:[#allocation9 + $0x28] sm:$0xff]  ;;  %v2266_v25 = vpack.c.bf16 %v258_v21, %v257_v20  ;;  %v260_v27 = vld [vmem:[#allocation10 + $0x58] sm:$0xff] }
  0x73   :  { %2231 = vmatpush3.bf16.msra.mxu0 %v2230_v16  ;;  %v2236_v28 = vpack.c.bf16 %v139_v24, %v138_v23  ;;  %v960_v29 = vld [vmem:[%s3560_s2] sm:$0xff]  ;;  %v140_v30 = vld [vmem:[#allocation9 + $0x30] sm:$0xff]  ;;  %v141_v31 = vld [vmem:[#allocation9 + $0x38] sm:$0xff]  ;;  %v2269_v34 = vpack.c.bf16 %v260_v27, %v259_v26 }
  0x74   :  { %2258 = vmatpush3.bf16.msra.mxu1 %v2257_v8  ;;  %2232 = vmatprep.subr.bf16.mxu0 %v2698_v0  ;;  %v962_v32 = vld [vmem:[%s3560_s2 + $0x10] sm:$0xff]  ;;  %v961_v33 = vld [vmem:[%s3560_s2 + $0x8] sm:$0xff]  ;;  %v963_v35 = vld [vmem:[%s3560_s2 + $0x18] sm:$0xff]  ;;  %v2239_v38 = vpack.c.bf16 %v141_v31, %v140_v30 }
  0x75   :  { %2259 = vmatprep.subr.bf16.mxu1 %v2698_v0  ;;  %974 = vperm.xlu0 %2400, %v960_v29   ;;  %v261_v36 = vld [vmem:[#allocation10 + $0x60] sm:$0xff]  ;;  %v262_v37 = vld [vmem:[#allocation10 + $0x68] sm:$0xff]  ;;  %v263_v44 = vld [vmem:[#allocation10 + $0x70] sm:$0xff] }
  0x76   :  { %980 = vperm.xlu1 %2401, %v962_v32   ;;  %v142_v39 = vld [vmem:[#allocation9 + $0x40] sm:$0xff]  ;;  %v143_v40 = vld [vmem:[#allocation9 + $0x48] sm:$0xff]  ;;  %v2272_v42 = vpack.c.bf16 %v262_v37, %v261_v36  ;;  %v264_v45 = vld [vmem:[#allocation10 + $0x78] sm:$0xff] }
  0x77   :  { %2234 = vmatpush3.bf16.msra.mxu0 %v2233_v22  ;;  %v964_v41 = vld [vmem:[%s3560_s2 + $0x20] sm:$0xff]  ;;  %v965_v43 = vld [vmem:[%s3560_s2 + $0x28] sm:$0xff]  ;;  %v2242_v46 = vpack.c.bf16 %v143_v40, %v142_v39  ;;  %v144_v47 = vld [vmem:[#allocation9 + $0x50] sm:$0xff]  ;;  %v2275_v50 = vpack.c.bf16 %v264_v45, %v263_v44 }
  0x78   :  { %2261 = vmatpush3.bf16.msra.mxu1 %v2260_v11  ;;  %2235 = vmatprep.subr.bf16.mxu0 %v2698_v0  ;;  %v145_v48 = vld [vmem:[#allocation9 + $0x58] sm:$0xff]  ;;  %v966_v49 = vld [vmem:[%s3560_s2 + $0x30] sm:$0xff]  ;;  %v146_v53 = vld [vmem:[#allocation9 + $0x60] sm:$0xff] }
  0x79   :  { %2262 = vmatprep.subr.bf16.mxu1 %v2698_v0  ;;  %977 = vperm.xlu0 %2400, %v961_v33   ;;  %v967_v51 = vld [vmem:[%s3560_s2 + $0x38] sm:$0xff]  ;;  %v2245_v52 = vpack.c.bf16 %v145_v48, %v144_v47  ;;  %v147_v54 = vld [vmem:[#allocation9 + $0x68] sm:$0xff]  ;;  %v968_v55 = vld [vmem:[%s3560_s2 + $0x40] sm:$0xff] }
  0x7a   :  { %983 = vperm.xlu1 %2401, %v963_v35   ;;  %v236_v56 = vld [vmem:[#allocation7] sm:$0xff]  ;;  %v969_v57 = vld [vmem:[%s3560_s2 + $0x48] sm:$0xff]  ;;  %v2248_v58 = vpack.c.bf16 %v147_v54, %v146_v53  ;;  %v148_v59 = vld [vmem:[#allocation9 + $0x70] sm:$0xff] }
  0x7b   :  { %2237 = vmatpush3.bf16.msra.mxu0 %v2236_v28  ;;  %v149_v60 = vld [vmem:[#allocation9 + $0x78] sm:$0xff]  ;;  %v970_v61 = vld [vmem:[%s3560_s2 + $0x50] sm:$0xff]  ;;  %v237_v62 = vld [vmem:[#allocation7 + $0x8] sm:$0xff] }
  0x7c   :  { %2264 = vmatpush3.bf16.msra.mxu1 %v2263_v19  ;;  %2238 = vmatprep.subr.bf16.mxu0 %v2698_v0  ;;  %v971_v63 = vld [vmem:[%s3560_s2 + $0x58] sm:$0xff]  ;;  %v2251_v2 = vpack.c.bf16 %v149_v60, %v148_v59  ;;  %v972_v3 = vld [vmem:[%s3560_s2 + $0x60] sm:$0xff]  ;;  %v238_v4 = vld [vmem:[#allocation7 + $0x10] sm:$0xff] }
  0x7d   :  { %2265 = vmatprep.subr.bf16.mxu1 %v2698_v0  ;;  %986 = vperm.xlu0 %2400, %v964_v41   ;;  %v131_v5 = vld [vmem:[#allocation4] sm:$0xff]  ;;  %v239_v6 = vld [vmem:[#allocation7 + $0x18] sm:$0xff]  ;;  %v132_v7 = vld [vmem:[#allocation4 + $0x8] sm:$0xff] }
  0x7e   :  { %989 = vperm.xlu1 %2401, %v965_v43   ;;  %v240_v8 = vld [vmem:[#allocation7 + $0x20] sm:$0xff]  ;;  %v133_v9 = vld [vmem:[#allocation4 + $0x10] sm:$0xff]  ;;  %v241_v10 = vld [vmem:[#allocation7 + $0x28] sm:$0xff] }
  0x7f   :  { %2240 = vmatpush3.bf16.msra.mxu0 %v2239_v38  ;;  %v242_v11 = vld [vmem:[#allocation7 + $0x30] sm:$0xff]  ;;  %v243_v12 = vld [vmem:[#allocation7 + $0x38] sm:$0xff]  ;;  %v244_v13 = vld [vmem:[#allocation7 + $0x40] sm:$0xff] }
  0x80   :  { %2267 = vmatpush3.bf16.msra.mxu1 %v2266_v25  ;;  %2241 = vmatprep.subr.bf16.mxu0 %v2698_v0  ;;  %v245_v14 = vld [vmem:[#allocation7 + $0x48] sm:$0xff]  ;;  %v246_v15 = vld [vmem:[#allocation7 + $0x50] sm:$0xff]  ;;  %v247_v16 = vld [vmem:[#allocation7 + $0x58] sm:$0xff] }
  0x81   :  { %2268 = vmatprep.subr.bf16.mxu1 %v2698_v0  ;;  %992 = vperm.xlu0 %2400, %v966_v49   ;;  %v248_v17 = vld [vmem:[#allocation7 + $0x60] sm:$0xff]  ;;  %v597_v18 = vld [vmem:[%s3565_s7] sm:$0xff]  ;;  %v598_v19 = vld [vmem:[%s3565_s7 + $0x8] sm:$0xff] }
  0x82   :  { %995 = vperm.xlu1 %2401, %v967_v51   ;;  %v2278_v20 = vpack.c.bf16 %v598_v19, %v597_v18  ;;  %v599_v21 = vld [vmem:[%s3565_s7 + $0x10] sm:$0xff]  ;;  %v600_v22 = vld [vmem:[%s3565_s7 + $0x18] sm:$0xff]  ;;  %v601_v24 = vld [vmem:[%s3565_s7 + $0x20] sm:$0xff] }
  0x83   :  { %2243 = vmatpush3.bf16.msra.mxu0 %v2242_v46  ;;  %v2281_v23 = vpack.c.bf16 %v600_v22, %v599_v21  ;;  %v602_v25 = vld [vmem:[%s3565_s7 + $0x28] sm:$0xff]  ;;  %v603_v27 = vld [vmem:[%s3565_s7 + $0x30] sm:$0xff]  ;;  %v604_v28 = vld [vmem:[%s3565_s7 + $0x38] sm:$0xff] }
  0x84   :  { %2270 = vmatpush3.bf16.msra.mxu1 %v2269_v34  ;;  %2244 = vmatprep.subr.bf16.mxu0 %v2698_v0  ;;  %v2284_v26 = vpack.c.bf16 %v602_v25, %v601_v24  ;;  %v2287_v29 = vpack.c.bf16 %v604_v28, %v603_v27  ;;  %v605_v30 = vld [vmem:[%s3565_s7 + $0x40] sm:$0xff]  ;;  %v606_v31 = vld [vmem:[%s3565_s7 + $0x48] sm:$0xff]  ;;  %v607_v33 = vld [vmem:[%s3565_s7 + $0x50] sm:$0xff] }
  0x85   :  { %2271 = vmatprep.subr.bf16.mxu1 %v2698_v0  ;;  %998 = vperm.xlu0 %2400, %v968_v55   ;;  %v2290_v32 = vpack.c.bf16 %v606_v31, %v605_v30  ;;  %v608_v34 = vld [vmem:[%s3565_s7 + $0x58] sm:$0xff]  ;;  %v609_v36 = vld [vmem:[%s3565_s7 + $0x60] sm:$0xff]  ;;  %v610_v37 = vld [vmem:[%s3565_s7 + $0x68] sm:$0xff] }
  0x86   :  { %1001 = vperm.xlu1 %2401, %v969_v57   ;;  %v2293_v35 = vpack.c.bf16 %v608_v34, %v607_v33  ;;  %v2296_v38 = vpack.c.bf16 %v610_v37, %v609_v36  ;;  %v611_v39 = vld [vmem:[%s3565_s7 + $0x70] sm:$0xff]  ;;  %v612_v40 = vld [vmem:[%s3565_s7 + $0x78] sm:$0xff] }
  0x87   :  { %2246 = vmatpush3.bf16.msra.mxu0 %v2245_v52  ;;  %v2299_v41 = vpack.c.bf16 %v612_v40, %v611_v39 }
  0x88   :  { %2273 = vmatpush3.bf16.msra.mxu1 %v2272_v42  ;;  %2247 = vmatprep.subr.bf16.mxu0 %v2698_v0  ;;  %v3045_v42 = vld [vmem:[%s3564_s6] ss:$0 sm:$0xff] }
  0x89   :  { %2274 = vmatprep.subr.bf16.mxu1 %v2698_v0  ;;  %1004 = vperm.xlu0 %2400, %v970_v61  }
  0x8a   :  { %1007 = vperm.xlu1 %2401, %v971_v63  }
  0x8b   :  { %2249 = vmatpush3.bf16.msra.mxu0 %v2248_v58 }
  0x8c   :  { %2276 = vmatpush3.bf16.msra.mxu1 %v2275_v50  ;;  %2250 = vmatprep.subr.bf16.mxu0 %v2698_v0 }
  0x8d   :  { %2370 = vmatprep.subr.bf16.mxu1 %v2698_v0  ;;  %1010 = vperm.xlu0 %2400, %v972_v3  }
  0x8f   :  { %1958 = vmatmul.mubr.f32.vlgmr.msra.gmra.mrb[0].mxu1 %v236_v56  ;;  %2252 = vmatpush3.bf16.msra.mxu0 %v2251_v2 }
  0x90   :  { %1960 = vmatprep.mubr.msk.f32.mxu1 %vm2699_vm0, %v2700_v1  ;;  %2277 = vmatprep.subr.bf16.mxu0 %v2698_v0 }
  0x91   :  { %2378 = vmatpush3.bf16.msra.mxu1 %v2278_v20 }
  0x92   :  { %1917 = vmatmul.mubr.f32.vlgmr.msra.gmra.mrb[0].mxu0 %v131_v5  ;;  %2371 = vmatprep.subr.bf16.mxu1 %v2698_v0 }
  0x93   :  { %1961 = vmatmul.mubr.f32.gmra.mrb[2].mxu1 %v237_v62  ;;  %1919 = vmatprep.mubr.msk.f32.mxu0 %vm2699_vm0, %v2700_v1 }
  0x94   :  { %1963 = vmatprep.mubr.msk.f32.mxu1 %vm2699_vm0, %v2700_v1  ;;  %2279 = vmatpush3.bf16.msra.mxu0 %v2278_v20 }
  0x95   :  { %2280 = vmatprep.subr.bf16.mxu0 %v2698_v0  ;;  %2379 = vmatpush3.bf16.msra.mxu1 %v2281_v23 }
  0x96   :  { %1920 = vmatmul.mubr.f32.gmra.mrb[2].mxu0 %v132_v7  ;;  %2372 = vmatprep.subr.bf16.mxu1 %v2698_v0 }
  0x97   :  { %1964 = vmatmul.mubr.f32.gmra.mrb[4].mxu1 %v238_v4  ;;  %1922 = vmatprep.mubr.msk.f32.mxu0 %vm2699_vm0, %v2700_v1 }
  0x98   :  { %1966 = vmatprep.mubr.msk.f32.mxu1 %vm2699_vm0, %v2700_v1  ;;  %2282 = vmatpush3.bf16.msra.mxu0 %v2281_v23 }
  0x99   :  { %2283 = vmatprep.subr.bf16.mxu0 %v2698_v0  ;;  %2380 = vmatpush3.bf16.msra.mxu1 %v2284_v26 }
  0x9a   :  { %1923 = vmatmul.mubr.f32.gmra.mrb[4].mxu0 %v133_v9  ;;  %2373 = vmatprep.subr.bf16.mxu1 %v2698_v0 }
  0x9b   :  { %1967 = vmatmul.mubr.f32.gmra.mrb[6].mxu1 %v239_v6  ;;  %2028 = vmatprep.mubr.msk.f32.mxu0 %vm2699_vm0, %v2700_v1 }
  0x9c   :  { %1969 = vmatprep.mubr.msk.f32.mxu1 %vm2699_vm0, %v2700_v1  ;;  %2285 = vmatpush3.bf16.msra.mxu0 %v2284_v26 }
  0x9d   :  { %2286 = vmatprep.subr.bf16.mxu0 %v2698_v0  ;;  %2381 = vmatpush3.bf16.msra.mxu1 %v2287_v29 }
  0x9e   :  { %2374 = vmatprep.subr.bf16.mxu1 %v2698_v0 }
  0x9f   :  { %1970 = vmatmul.mubr.f32.gmra.mrb[8].mxu1 %v240_v8 }
  0xa0   :  { %1972 = vmatprep.mubr.msk.f32.mxu1 %vm2699_vm0, %v2700_v1  ;;  %2288 = vmatpush3.bf16.msra.mxu0 %v2287_v29 }
  0xa1   :  { %2289 = vmatprep.subr.bf16.mxu0 %v2698_v0  ;;  %2382 = vmatpush3.bf16.msra.mxu1 %v2290_v32 }
  0xa2   :  { %2375 = vmatprep.subr.bf16.mxu1 %v2698_v0 }
  0xa3   :  { %1973 = vmatmul.mubr.f32.gmra.mrb[10].mxu1 %v241_v10 }
  0xa4   :  { %1975 = vmatprep.mubr.msk.f32.mxu1 %vm2699_vm0, %v2700_v1  ;;  %2291 = vmatpush3.bf16.msra.mxu0 %v2290_v32 }
  0xa5   :  { %2292 = vmatprep.subr.bf16.mxu0 %v2698_v0  ;;  %2383 = vmatpush3.bf16.msra.mxu1 %v2293_v35 }
  0xa6   :  { %2376 = vmatprep.subr.bf16.mxu1 %v2698_v0 }
  0xa7   :  { %1976 = vmatmul.mubr.f32.gmra.mrb[12].mxu1 %v242_v11 }
  0xa8   :  { %1978 = vmatprep.mubr.msk.f32.mxu1 %vm2699_vm0, %v2700_v1  ;;  %2294 = vmatpush3.bf16.msra.mxu0 %v2293_v35 }
  0xa9   :  { %2295 = vmatprep.subr.bf16.mxu0 %v2698_v0  ;;  %2384 = vmatpush3.bf16.msra.mxu1 %v2296_v38 }
  0xaa   :  { %2377 = vmatprep.subr.bf16.mxu1 %v2698_v0 }
  0xab   :  { %1979 = vmatmul.mubr.f32.gmra.mrb[14].mxu1 %v243_v12 }
  0xac   :  { %1981 = vmatprep.mubr.msk.f32.mxu1 %vm2699_vm0, %v2700_v1  ;;  %2297 = vmatpush3.bf16.msra.mxu0 %v2296_v38 }
  0xad   :  { %2298 = vmatprep.subr.bf16.mxu0 %v2698_v0  ;;  %2385 = vmatpush3.bf16.msra.mxu1 %v2299_v41 }
  0xae   :  { %2301 = vmatprep.subr.bf16.mxu1 %v2698_v0 }
  0xaf   :  { %1982 = vmatmul.mubr.f32.gmra.mrb[16].mxu1 %v244_v13 }
  0xb0   :  { %1984 = vmatprep.mubr.msk.f32.mxu1 %vm2699_vm0, %v2700_v1  ;;  %2300 = vmatpush3.bf16.msra.mxu0 %v2299_v41 }
  0xb1   :  { %2304 = vmatprep.subr.bf16.mxu0 %v2698_v0 }
  0xb3   :  { %1985 = vmatmul.mubr.f32.gmra.mrb[18].mxu1 %v245_v14 }
  0xb4   :  { %1987 = vmatprep.mubr.msk.f32.mxu1 %vm2699_vm0, %v2700_v1 }
  0xb7   :  { %1988 = vmatmul.mubr.f32.gmra.mrb[20].mxu1 %v246_v15 }
  0xb8   :  { %1990 = vmatprep.mubr.msk.f32.mxu1 %vm2699_vm0, %v2700_v1 }
  0xbb   :  { %1991 = vmatmul.mubr.f32.gmra.mrb[22].mxu1 %v247_v16 }
  0xbc   :  { %1993 = vmatprep.mubr.msk.f32.mxu1 %vm2699_vm0, %v2700_v1 }
  0xbf   :  { %1994 = vmatmul.mubr.f32.gmra.mrb[24].mxu1 %v248_v17 }
  0xc0   :  { %2064 = vmatprep.mubr.msk.f32.mxu1 %vm2699_vm0, %v2700_v1 }
 0x162   :  { %v338_v43 = vpop.f32.mrb[0].mxu1 }
 0x163   :  { %v3048_v44 = vadd.f32 %v3045_v42, %v338_v43  ;;  %v1959_v45 = vpop.f32.mrb[1].mxu1 }
 0x165   :  { %v415_v46 = vand.u32 2147483647, %v3048_v44  ;;  %v3058_v57 = vpop.f32.mrb[0].mxu0 }
 0x166   :  { %v343_v47 = vpop.f32.mrb[2].mxu1  ;;  %v1918_v58 = vpop.f32.mrb[1].mxu0 }
 0x167   :  { %v428_v48 = vsub.f32 0.0, %v415_v46  ;;  %v3052_v49 = vadd.f32 %v3045_v42, %v343_v47  ;;  %v1962_v50 = vpop.f32.mrb[3].mxu1 }
 0x169   :  { %v441_v51 = vmul.f32 1.442695, %v428_v48  ;;  %v416_v52 = vand.u32 2147483647, %v3052_v49  ;;  %v3064_v3 = vpop.f32.mrb[2].mxu0 }
 0x16a   :  { %v348_v53 = vpop.f32.mrb[4].mxu1  ;;  %v2302_v4 = vpack.c.bf16 %v3064_v3, %v3058_v57  ;;  %v1921_v5 = vpop.f32.mrb[3].mxu0 }
 0x16b   :  { %2404 = vpow2.f32 %v441_v51  ;;  %v429_v54 = vsub.f32 0.0, %v416_v52  ;;  %v3056_v55 = vadd.f32 %v3045_v42, %v348_v53  ;;  %v1965_v56 = vpop.f32.mrb[5].mxu1 }
 0x16d   :  { %v443_v59 = vmul.f32 1.442695, %v429_v54  ;;  %v417_v60 = vand.u32 2147483647, %v3056_v55  ;;  %v3072_v12 = vpop.f32.mrb[4].mxu0 }
 0x16e   :  { %v353_v61 = vpop.f32.mrb[6].mxu1  ;;  %v1924_v13 = vpop.f32.mrb[5].mxu0 }
 0x16f   :  { %2406 = vpow2.f32 %v443_v59  ;;  %v430_v62 = vsub.f32 0.0, %v417_v60  ;;  %v3062_v63 = vadd.f32 %v3045_v42, %v353_v61  ;;  %v1968_v2 = vpop.f32.mrb[7].mxu1  ;;  %v402_v60 = vmax.f32 %v3048_v44, 0.0 }
 0x171   :  { %v445_v6 = vmul.f32 1.442695, %v430_v62  ;;  %v418_v7 = vand.u32 2147483647, %v3062_v63 }
 0x172   :  { %v358_v8 = vpop.f32.mrb[8].mxu1 }
 0x173   :  { %2408 = vpow2.f32 %v445_v6  ;;  %v431_v9 = vsub.f32 0.0, %v418_v7  ;;  %v3070_v10 = vadd.f32 %v3045_v42, %v358_v8  ;;  %v1971_v11 = vpop.f32.mrb[9].mxu1 }
 0x175   :  { %v2405_v14 = vpop.eup %2404  ;;  %v447_v15 = vmul.f32 1.442695, %v431_v9  ;;  %v419_v16 = vand.u32 2147483647, %v3070_v10 }
 0x176   :  { %v467_v17 = vadd.f32 1.0, %v2405_v14  ;;  %v363_v18 = vpop.f32.mrb[10].mxu1  ;;  %v470_v25 = vmul.f32 -0.5, %v2405_v14  ;;  %v473_v41 = vand.u32 2147483647, %v2405_v14 }
 0x177   :  { %2410 = vpow2.f32 %v447_v15  ;;  %v432_v19 = vsub.f32 0.0, %v419_v16  ;;  %v3076_v20 = vadd.f32 %v3045_v42, %v363_v18  ;;  %v1974_v21 = vpop.f32.mrb[11].mxu1 }
 0x178   :  { %2412 = vlog2.f32 %v467_v17  ;;  %v471_v35 = vadd.f32 1.0, %v470_v25  ;;  %vm474_vm1 = vcmp.lt.f32.partialorder %v473_v41, 0.0004427343 }
 0x179   :  { %v2407_v22 = vpop.eup %2406  ;;  %v449_v23 = vmul.f32 1.442695, %v432_v19  ;;  %v420_v24 = vand.u32 2147483647, %v3076_v20  ;;  %v403_v19 = vmax.f32 %v3052_v49, 0.0 }
 0x17a   :  { %v368_v26 = vpop.f32.mrb[12].mxu1  ;;  %v476_v27 = vadd.f32 1.0, %v2407_v22  ;;  %v479_v34 = vmul.f32 -0.5, %v2407_v22  ;;  %v472_v50 = vmul.f32 %v2405_v14, %v471_v35  ;;  %v482_v61 = vand.u32 2147483647, %v2407_v22 }
 0x17b   :  { %2414 = vpow2.f32 %v449_v23  ;;  %v433_v28 = vsub.f32 0.0, %v420_v24  ;;  %v3080_v29 = vadd.f32 %v3045_v42, %v368_v26  ;;  %v1977_v30 = vpop.f32.mrb[13].mxu1 }
 0x17c   :  { %2416 = vlog2.f32 %v476_v27  ;;  %v480_v47 = vadd.f32 1.0, %v479_v34  ;;  %vm483_vm2 = vcmp.lt.f32.partialorder %v482_v61, 0.0004427343  ;;  %v405_v61 = vmax.f32 %v3062_v63, 0.0 }
 0x17d   :  { %v3082_v31 = vpop.eup %2408  ;;  %v451_v32 = vmul.f32 1.442695, %v433_v28  ;;  %v421_v33 = vand.u32 2147483647, %v3080_v29 }
 0x17e   :  { %v373_v36 = vpop.f32.mrb[14].mxu1  ;;  %v485_v37 = vadd.f32 1.0, %v3082_v31  ;;  %v488_v52 = vmul.f32 -0.5, %v3082_v31  ;;  %v481_v7 = vmul.f32 %v2407_v22, %v480_v47  ;;  %v491_v21 = vand.u32 2147483647, %v3082_v31 }
 0x17f   :  { %2418 = vpow2.f32 %v451_v32  ;;  %v434_v38 = vsub.f32 0.0, %v421_v33  ;;  %v3087_v39 = vadd.f32 %v3045_v42, %v373_v36  ;;  %v1980_v40 = vpop.f32.mrb[15].mxu1 }
 0x180   :  { %2420 = vlog2.f32 %v485_v37  ;;  %v489_v13 = vadd.f32 1.0, %v488_v52  ;;  %vm492_vm3 = vcmp.lt.f32.partialorder %v491_v21, 0.0004427343  ;;  %v406_v21 = vmax.f32 %v3070_v10, 0.0 }
 0x181   :  { %v3089_v43 = vpop.eup %2410  ;;  %v453_v45 = vmul.f32 1.442695, %v434_v38  ;;  %v422_v46 = vand.u32 2147483647, %v3087_v39  ;;  %v404_v38 = vmax.f32 %v3056_v55, 0.0 }
 0x182   :  { %v2413_v48 = vpop.eup %2412  ;;  %v378_v51 = vpop.f32.mrb[16].mxu1  ;;  %v494_v53 = vadd.f32 1.0, %v3089_v43  ;;  %v497_v14 = vmul.f32 -0.5, %v3089_v43  ;;  %v490_v49 = vmul.f32 %v3082_v31, %v489_v13  ;;  %v500_v40 = vand.u32 2147483647, %v3089_v43 }
 0x183   :  { %v469_v54 = vmul.f32 0.6931472, %v2413_v48  ;;  %2422 = vpow2.f32 %v453_v45  ;;  %v435_v56 = vsub.f32 0.0, %v422_v46  ;;  %v3095_v58 = vadd.f32 %v3045_v42, %v378_v51  ;;  %v1983_v59 = vpop.f32.mrb[17].mxu1 }
 0x184   :  { %2424 = vlog2.f32 %v494_v53  ;;  %v498_v32 = vadd.f32 1.0, %v497_v14  ;;  %vm501_vm4 = vcmp.lt.f32.partialorder %v500_v40, 0.0004427343 }
 0x185   :  { %v3098_v62 = vpop.eup %2414  ;;  %v475_v2 = vsel %vm474_vm1, %v472_v50, %v469_v54  ;;  %v455_v5 = vmul.f32 1.442695, %v435_v56  ;;  %v423_v6 = vand.u32 2147483647, %v3095_v58 }
 0x186   :  { %v2417_v8 = vpop.eup %2416  ;;  %v584_v9 = vadd.f32 %v475_v2, %v402_v60  ;;  %v383_v11 = vpop.f32.mrb[18].mxu1  ;;  %v503_v15 = vadd.f32 1.0, %v3098_v62  ;;  %v506_v26 = vmul.f32 -0.5, %v3098_v62  ;;  %v499_v55 = vmul.f32 %v3089_v43, %v498_v32 }
 0x187   :  { %2426 = vpow2.f32 %v455_v5  ;;  %v436_v44 = vsub.f32 0.0, %v423_v6  ;;  %v3104_v16 = vadd.f32 %v3045_v42, %v383_v11  ;;  %v1986_v17 = vpop.f32.mrb[19].mxu1  ;;  %v478_v18 = vmul.f32 0.6931472, %v2417_v8 }
 0x188   :  { %2029 = vmatmul.mubr.f32.vlgmr.msra.gmra.mrb[6].mxu0 %v584_v9  ;;  %2428 = vlog2.f32 %v503_v15  ;;  %v507_v47 = vadd.f32 1.0, %v506_v26  ;;  %v509_v2 = vand.u32 2147483647, %v3098_v62 }
 0x189   :  { %v3108_v22 = vpop.eup %2418  ;;  %v457_v23 = vmul.f32 1.442695, %v436_v44  ;;  %v424_v24 = vand.u32 2147483647, %v3104_v16  ;;  %2031 = vmatprep.mubr.msk.f32.mxu0 %vm2699_vm0, %v2700_v1  ;;  %v484_v25 = vsel %vm483_vm2, %v481_v7, %v478_v18 }
 0x18a   :  { %v2421_v27 = vpop.eup %2420  ;;  %v388_v28 = vpop.f32.mrb[20].mxu1  ;;  %v585_v30 = vadd.f32 %v484_v25, %v403_v19  ;;  %v512_v33 = vadd.f32 1.0, %v3108_v22  ;;  %v515_v52 = vmul.f32 -0.5, %v3108_v22  ;;  %v508_v8 = vmul.f32 %v3098_v62, %v507_v47 }
 0x18b   :  { %2430 = vpow2.f32 %v457_v23  ;;  %v437_v34 = vsub.f32 0.0, %v424_v24  ;;  %v3117_v35 = vadd.f32 %v3045_v42, %v388_v28  ;;  %v1989_v36 = vpop.f32.mrb[21].mxu1  ;;  %v487_v37 = vmul.f32 0.6931472, %v2421_v27 }
 0x18c   :  { %2032 = vmatmul.mubr.f32.gmra.mrb[8].mxu0 %v585_v30  ;;  %2432 = vlog2.f32 %v512_v33  ;;  %v516_v63 = vadd.f32 1.0, %v515_v52  ;;  %vm510_vm5 = vcmp.lt.f32.partialorder %v509_v2, 0.0004427343  ;;  %v518_v62 = vand.u32 2147483647, %v3108_v22 }
 0x18d   :  { %v3121_v41 = vpop.eup %2422  ;;  %v459_v31 = vmul.f32 1.442695, %v437_v34  ;;  %v425_v45 = vand.u32 2147483647, %v3117_v35  ;;  %2034 = vmatprep.mubr.msk.f32.mxu0 %vm2699_vm0, %v2700_v1  ;;  %v493_v46 = vsel %vm492_vm3, %v490_v49, %v487_v37  ;;  %v407_v34 = vmax.f32 %v3076_v20, 0.0 }
 0x18e   :  { %v2425_v48 = vpop.eup %2424  ;;  %v393_v50 = vpop.f32.mrb[22].mxu1  ;;  %v586_v51 = vadd.f32 %v493_v46, %v404_v38  ;;  %v521_v53 = vadd.f32 1.0, %v3121_v41  ;;  %v524_v14 = vmul.f32 -0.5, %v3121_v41  ;;  %v517_v28 = vmul.f32 %v3108_v22, %v516_v63 }
 0x18f   :  { %2434 = vpow2.f32 %v459_v31  ;;  %v438_v54 = vsub.f32 0.0, %v425_v45  ;;  %v3130_v56 = vadd.f32 %v3045_v42, %v393_v50  ;;  %v1992_v59 = vpop.f32.mrb[23].mxu1  ;;  %v496_v60 = vmul.f32 0.6931472, %v2425_v48 }
 0x190   :  { %2035 = vmatmul.mubr.f32.gmra.mrb[10].mxu0 %v586_v51  ;;  %2436 = vlog2.f32 %v521_v53  ;;  %v525_v30 = vadd.f32 1.0, %v524_v14  ;;  %vm519_vm6 = vcmp.lt.f32.partialorder %v518_v62, 0.0004427343  ;;  %v527_v36 = vand.u32 2147483647, %v3121_v41 }
 0x191   :  { %v3134_v5 = vpop.eup %2426  ;;  %v461_v43 = vmul.f32 1.442695, %v438_v54  ;;  %v426_v6 = vand.u32 2147483647, %v3130_v56  ;;  %2037 = vmatprep.mubr.msk.f32.mxu0 %vm2699_vm0, %v2700_v1  ;;  %v502_v7 = vsel %vm501_vm4, %v499_v55, %v496_v60  ;;  %v408_v50 = vmax.f32 %v3080_v29, 0.0 }
 0x192   :  { %v2429_v9 = vpop.eup %2428  ;;  %v398_v11 = vpop.f32.mrb[24].mxu1  ;;  %v587_v13 = vadd.f32 %v502_v7, %v405_v61  ;;  %v530_v15 = vadd.f32 1.0, %v3134_v5  ;;  %v533_v33 = vmul.f32 -0.5, %v3134_v5  ;;  %v526_v45 = vmul.f32 %v3121_v41, %v525_v30 }
 0x193   :  { %2438 = vpow2.f32 %v461_v43  ;;  %v439_v44 = vsub.f32 0.0, %v426_v6  ;;  %v3143_v17 = vadd.f32 %v3045_v42, %v398_v11  ;;  %v1995_v18 = vpop.f32.mrb[25].mxu1  ;;  %v505_v19 = vmul.f32 0.6931472, %v2429_v9 }
 0x194   :  { %2038 = vmatmul.mubr.f32.gmra.mrb[12].mxu0 %v587_v13  ;;  %2440 = vlog2.f32 %v530_v15  ;;  %v534_v48 = vadd.f32 1.0, %v533_v33  ;;  %vm528_vm7 = vcmp.lt.f32.partialorder %v527_v36, 0.0004427343  ;;  %v536_v51 = vand.u32 2147483647, %v3134_v5 }
 0x195   :  { %v3147_v23 = vpop.eup %2430  ;;  %v463_v24 = vmul.f32 1.442695, %v439_v44  ;;  %v427_v25 = vand.u32 2147483647, %v3143_v17  ;;  %2040 = vmatprep.mubr.msk.f32.mxu0 %vm2699_vm0, %v2700_v1  ;;  %v511_v26 = vsel %vm510_vm5, %v508_v8, %v505_v19  ;;  %v409_v29 = vmax.f32 %v3087_v39, 0.0 }
 0x196   :  { %v2433_v42 = vpop.eup %2432  ;;  %v588_v27 = vadd.f32 %v511_v26, %v406_v21  ;;  %v539_v10 = vadd.f32 1.0, %v3147_v23  ;;  %v542_v20 = vmul.f32 -0.5, %v3147_v23  ;;  %v535_v60 = vmul.f32 %v3134_v5, %v534_v48 }
 0x197   :  { %2442 = vpow2.f32 %v463_v24  ;;  %v440_v49 = vsub.f32 0.0, %v427_v25  ;;  %v514_v32 = vmul.f32 0.6931472, %v2433_v42  ;;  %vm537_vm8 = vcmp.lt.f32.partialorder %v536_v51, 0.0004427343 }
 0x198   :  { %2041 = vmatmul.mubr.f32.gmra.mrb[14].mxu0 %v588_v27  ;;  %2444 = vlog2.f32 %v539_v10  ;;  %v543_v61 = vadd.f32 1.0, %v542_v20  ;;  %v545_v43 = vand.u32 2147483647, %v3147_v23  ;;  %v410_v39 = vmax.f32 %v3095_v58, 0.0 }
 0x199   :  { %v2435_v37 = vpop.eup %2434  ;;  %v465_v38 = vmul.f32 1.442695, %v440_v49  ;;  %2043 = vmatprep.mubr.msk.f32.mxu0 %vm2699_vm0, %v2700_v1  ;;  %v520_v22 = vsel %vm519_vm6, %v517_v28, %v514_v32  ;;  %v411_v42 = vmax.f32 %v3104_v16, 0.0 }
 0x19a   :  { %v2437_v40 = vpop.eup %2436  ;;  %v589_v31 = vadd.f32 %v520_v22, %v407_v34  ;;  %v548_v46 = vadd.f32 1.0, %v2435_v37  ;;  %v551_v2 = vmul.f32 -0.5, %v2435_v37  ;;  %v544_v5 = vmul.f32 %v3147_v23, %v543_v61 }
 0x19b   :  { %2446 = vpow2.f32 %v465_v38  ;;  %v523_v47 = vmul.f32 0.6931472, %v2437_v40  ;;  %vm546_vm9 = vcmp.lt.f32.partialorder %v545_v43, 0.0004427343  ;;  %v554_v15 = vand.u32 2147483647, %v2435_v37 }
 0x19c   :  { %2044 = vmatmul.mubr.f32.gmra.mrb[16].mxu0 %v589_v31  ;;  %2448 = vlog2.f32 %v548_v46  ;;  %v552_v63 = vadd.f32 1.0, %v551_v2  ;;  %v412_v34 = vmax.f32 %v3117_v35, 0.0 }
 0x19d   :  { %v2439_v55 = vpop.eup %2438  ;;  %2046 = vmatprep.mubr.msk.f32.mxu0 %vm2699_vm0, %v2700_v1  ;;  %v529_v52 = vsel %vm528_vm7, %v526_v45, %v523_v47  ;;  %vm555_vm10 = vcmp.lt.f32.partialorder %v554_v15, 0.0004427343  ;;  %v413_v45 = vmax.f32 %v3130_v56, 0.0  ;;  %v958_v47 = vlaneseq }
 0x19e   :  { %v2441_v53 = vpop.eup %2440  ;;  %v590_v41 = vadd.f32 %v529_v52, %v408_v50  ;;  %v557_v54 = vadd.f32 1.0, %v2439_v55  ;;  %v560_v14 = vmul.f32 -0.5, %v2439_v55  ;;  %v553_v25 = vmul.f32 %v2435_v37, %v552_v63 }
 0x19f   :  { %v532_v59 = vmul.f32 0.6931472, %v2441_v53  ;;  %v563_v58 = vand.u32 2147483647, %v2439_v55  ;;  %v3185_v52 = vand.u32 127, %v958_v47 }
 0x1a0   :  { %2047 = vmatmul.mubr.f32.gmra.mrb[18].mxu0 %v590_v41  ;;  %2450 = vlog2.f32 %v557_v54  ;;  %v561_v26 = vadd.f32 1.0, %v560_v14  ;;  %v975_v41 = vpop.permute.xlu0 %974 }
 0x1a1   :  { %v2443_v6 = vpop.eup %2442  ;;  %2049 = vmatprep.mubr.msk.f32.mxu0 %vm2699_vm0, %v2700_v1  ;;  %v538_v7 = vsel %vm537_vm8, %v535_v60, %v532_v59  ;;  %vm564_vm11 = vcmp.lt.f32.partialorder %v563_v58, 0.0004427343  ;;  %vm1012_vm14 = vcmp.eq.s32.totalorder %v975_v41, %v3185_v52  ;;  %v981_v59 = vpop.permute.xlu1 %980 }
 0x1a2   :  { %v2445_v8 = vpop.eup %2444  ;;  %v591_v9 = vadd.f32 %v538_v7, %v409_v29  ;;  %v566_v11 = vadd.f32 1.0, %v2443_v6  ;;  %v569_v23 = vmul.f32 -0.5, %v2443_v6  ;;  %v562_v32 = vmul.f32 %v2439_v55, %v561_v26 }
 0x1a3   :  { %v541_v13 = vmul.f32 0.6931472, %v2445_v8  ;;  %v572_v36 = vand.u32 2147483647, %v2443_v6  ;;  %v414_v55 = vmax.f32 %v3143_v17, 0.0  ;;  %v1701_v17 = vsel %vm1012_vm14, 1.0, %v2700_v1 }
 0x1a4   :  { %2050 = vmatmul.mubr.f32.gmra.mrb[20].mxu0 %v591_v9  ;;  %2452 = vlog2.f32 %v566_v11  ;;  %v570_v33 = vadd.f32 1.0, %v569_v23  ;;  %v978_v54 = vpop.permute.xlu0 %977  ;;  %vm1014_vm2 = vcmp.eq.s32.totalorder %v981_v59, %v3185_v52 }
 0x1a5   :  { %v2447_v44 = vpop.eup %2446  ;;  %2052 = vmatprep.mubr.msk.f32.mxu0 %vm2699_vm0, %v2700_v1  ;;  %v547_v18 = vsel %vm546_vm9, %v544_v5, %v541_v13  ;;  %vm573_vm12 = vcmp.lt.f32.partialorder %v572_v36, 0.0004427343  ;;  %vm1013_vm1 = vcmp.eq.s32.totalorder %v978_v54, %v3185_v52  ;;  %v1703_v3 = vsel %vm1014_vm2, 1.0, %v2700_v1 }
 0x1a6   :  { %v2449_v19 = vpop.eup %2448  ;;  %v575_v21 = vadd.f32 1.0, %v2447_v44  ;;  %v592_v62 = vadd.f32 %v547_v18, %v410_v39  ;;  %v578_v10 = vmul.f32 -0.5, %v2447_v44  ;;  %v571_v31 = vmul.f32 %v2443_v6, %v570_v33 }
 0x1a7   :  { %v550_v24 = vmul.f32 0.6931472, %v2449_v19  ;;  %v581_v46 = vand.u32 2147483647, %v2447_v44  ;;  %v1702_v57 = vsel %vm1013_vm1, 1.0, %v2700_v1 }
 0x1a8   :  { %2454 = vlog2.f32 %v575_v21  ;;  %2053 = vmatmul.mubr.f32.gmra.mrb[22].mxu0 %v592_v62  ;;  %v579_v22 = vadd.f32 1.0, %v578_v10  ;;  %v3265_v19 = vld [vmem:[%s3566_s8] ss:$0 sm:$0xff] }
 0x1a9   :  { %2055 = vmatprep.mubr.msk.f32.mxu0 %vm2699_vm0, %v2700_v1  ;;  %v556_v27 = vsel %vm555_vm10, %v553_v25, %v550_v24  ;;  %vm582_vm13 = vcmp.lt.f32.partialorder %v581_v46, 0.0004427343 }
 0x1aa   :  { %v2451_v28 = vpop.eup %2450  ;;  %v593_v30 = vadd.f32 %v556_v27, %v411_v42  ;;  %v580_v51 = vmul.f32 %v2447_v44, %v579_v22 }
 0x1ab   :  { %v559_v49 = vmul.f32 0.6931472, %v2451_v28 }
 0x1ac   :  { %2056 = vmatmul.mubr.f32.gmra.mrb[24].mxu0 %v593_v30 }
 0x1ad   :  { %2058 = vmatprep.mubr.msk.f32.mxu0 %vm2699_vm0, %v2700_v1  ;;  %v565_v16 = vsel %vm564_vm11, %v562_v32, %v559_v49 }
 0x1ae   :  { %v2453_v37 = vpop.eup %2452  ;;  %v594_v38 = vadd.f32 %v565_v16, %v412_v34 }
 0x1af   :  { %v568_v40 = vmul.f32 0.6931472, %v2453_v37 }
 0x1b0   :  { %2059 = vmatmul.mubr.f32.gmra.mrb[26].mxu0 %v594_v38 }
 0x1b1   :  { %2061 = vmatprep.mubr.msk.f32.mxu0 %vm2699_vm0, %v2700_v1  ;;  %v574_v35 = vsel %vm573_vm12, %v571_v31, %v568_v40 }
 0x1b2   :  { %v2455_v48 = vpop.eup %2454  ;;  %v595_v20 = vadd.f32 %v574_v35, %v413_v45 }
 0x1b3   :  { %v577_v50 = vmul.f32 0.6931472, %v2455_v48 }
 0x1b4   :  { %2062 = vmatmul.mubr.f32.gmra.mrb[28].mxu0 %v595_v20 }
 0x1b5   :  { %v583_v56 = vsel %vm582_vm13, %v580_v51, %v577_v50  ;;  %2138 = vmatprep.mubr.msk.f32.mxu0 %vm2699_vm0, %v2700_v1  ;;  %vm1237_vm13 = vcmp.eq.s32.totalorder %v3185_v52, 32 }
 0x1b6   :  { %v596_v53 = vadd.f32 %v583_v56, %v414_v55 }
 0x1b8   :  { %2065 = vmatmul.mubr.f32.vlgmr.msra.gmra.mrb[26].mxu1 %v596_v53 }
 0x1b9   :  { %2303 = vmatpush3.bf16.msra.mxu1 %v2302_v4  ;;  %2073 = vmatprep.mubr.msk.f32.mxu1 %vm2699_vm0, %v2700_v1  ;;  %v984_v4 = vpop.permute.xlu1 %983 }
 0x1ba   :  { %2071 = vmatprep.subr.mxu1 %v2700_v1  ;;  %vm1015_vm3 = vcmp.eq.s32.totalorder %v984_v4, %v3185_v52 }
 0x1bb   :  { %v1704_v60 = vsel %vm1015_vm3, 1.0, %v2700_v1 }
 0x1bd   :  { %2072 = vmatpush3.msra.mxu1 %v3072_v12  ;;  %v987_v12 = vpop.permute.xlu0 %986  ;;  %v990_v2 = vpop.permute.xlu1 %989 }
 0x1be   :  { %2074 = vmatmul.mubr.msk.f32.vlgmr.msra.gmra.mrb[28].mxu1 %vm1054_vm15, %v1701_v17  ;;  %2322 = vmatprep.subr.bf16.mxu1 %v2698_v0  ;;  %vm1016_vm4 = vcmp.eq.s32.totalorder %v987_v12, %v3185_v52  ;;  %vm1017_vm5 = vcmp.eq.s32.totalorder %v990_v2, %v3185_v52 }
 0x1bf   :  { %2076 = vmatprep.mubr.msk.f32.mxu1 %vm2699_vm0, %v2700_v1  ;;  %v1705_v61 = vsel %vm1016_vm4, 1.0, %v2700_v1  ;;  %v1706_v43 = vsel %vm1017_vm5, 1.0, %v2700_v1 }
 0x1c1   :  { %v993_v29 = vpop.permute.xlu0 %992  ;;  %v996_v7 = vpop.permute.xlu1 %995 }
 0x1c2   :  { %2077 = vmatmul.mubr.msk.f32.gmra.mrb[30].mxu1 %vm1054_vm15, %v1702_v57  ;;  %vm1018_vm6 = vcmp.eq.s32.totalorder %v993_v29, %v3185_v52  ;;  %vm1019_vm7 = vcmp.eq.s32.totalorder %v996_v7, %v3185_v52 }
 0x1c3   :  { %2079 = vmatprep.mubr.msk.f32.mxu1 %vm2699_vm0, %v2700_v1  ;;  %v1707_v6 = vsel %vm1018_vm6, 1.0, %v2700_v1  ;;  %v1708_v9 = vsel %vm1019_vm7, 1.0, %v2700_v1 }
 0x1c5   :  { %v999_v8 = vpop.permute.xlu0 %998  ;;  %v1002_v13 = vpop.permute.xlu1 %1001 }
 0x1c6   :  { %2080 = vmatmul.mubr.msk.f32.gmra.mrb[32].mxu1 %vm1054_vm15, %v1703_v3  ;;  %vm1020_vm8 = vcmp.eq.s32.totalorder %v999_v8, %v3185_v52  ;;  %vm1021_vm9 = vcmp.eq.s32.totalorder %v1002_v13, %v3185_v52 }
 0x1c7   :  { %2082 = vmatprep.mubr.msk.f32.mxu1 %vm2699_vm0, %v2700_v1  ;;  %v1709_v11 = vsel %vm1020_vm8, 1.0, %v2700_v1  ;;  %v1710_v63 = vsel %vm1021_vm9, 1.0, %v2700_v1 }
 0x1c9   :  { %v1005_v5 = vpop.permute.xlu0 %1004  ;;  %v1008_v14 = vpop.permute.xlu1 %1007 }
 0x1ca   :  { %2083 = vmatmul.mubr.msk.f32.gmra.mrb[34].mxu1 %vm1054_vm15, %v1704_v60  ;;  %vm1022_vm10 = vcmp.eq.s32.totalorder %v1005_v5, %v3185_v52  ;;  %vm1023_vm11 = vcmp.eq.s32.totalorder %v1008_v14, %v3185_v52 }
 0x1cb   :  { %2085 = vmatprep.mubr.msk.f32.mxu1 %vm2699_vm0, %v2700_v1  ;;  %v1711_v39 = vsel %vm1022_vm10, 1.0, %v2700_v1  ;;  %v1712_v44 = vsel %vm1023_vm11, 1.0, %v2700_v1 }
 0x1cd   :  { %v1011_v15 = vpop.permute.xlu0 %1010 }
 0x1ce   :  { %2086 = vmatmul.mubr.msk.f32.gmra.mrb[36].mxu1 %vm1054_vm15, %v1705_v61  ;;  %vm1024_vm12 = vcmp.eq.s32.totalorder %v1011_v15, %v3185_v52 }
 0x1cf   :  { %2088 = vmatprep.mubr.msk.f32.mxu1 %vm2699_vm0, %v2700_v1  ;;  %v1713_v18 = vsel %vm1024_vm12, 1.0, %v2700_v1 }
 0x1d2   :  { %2089 = vmatmul.mubr.msk.f32.gmra.mrb[38].mxu1 %vm1054_vm15, %v1706_v43 }
 0x1d3   :  { %2091 = vmatprep.mubr.msk.f32.mxu1 %vm2699_vm0, %v2700_v1 }
 0x1d6   :  { %2092 = vmatmul.mubr.msk.f32.gmra.mrb[40].mxu1 %vm1054_vm15, %v1707_v6 }
 0x1d7   :  { %2094 = vmatprep.mubr.msk.f32.mxu1 %vm2699_vm0, %v2700_v1 }
 0x1da   :  { %2095 = vmatmul.mubr.msk.f32.gmra.mrb[42].mxu1 %vm1054_vm15, %v1708_v9 }
 0x1db   :  { %2097 = vmatprep.mubr.msk.f32.mxu1 %vm2699_vm0, %v2700_v1 }
 0x1de   :  { %2098 = vmatmul.mubr.msk.f32.gmra.mrb[44].mxu1 %vm1054_vm15, %v1709_v11 }
 0x1df   :  { %2100 = vmatprep.mubr.msk.f32.mxu1 %vm2699_vm0, %v2700_v1 }
 0x1e2   :  { %2101 = vmatmul.mubr.msk.f32.gmra.mrb[46].mxu1 %vm1054_vm15, %v1710_v63 }
 0x1e3   :  { %2103 = vmatprep.mubr.msk.f32.mxu1 %vm2699_vm0, %v2700_v1 }
 0x1e6   :  { %2104 = vmatmul.mubr.msk.f32.gmra.mrb[48].mxu1 %vm1054_vm15, %v1711_v39 }
 0x1e7   :  { %2106 = vmatprep.mubr.msk.f32.mxu1 %vm2699_vm0, %v2700_v1 }
 0x1ea   :  { %2107 = vmatmul.mubr.msk.f32.gmra.mrb[50].mxu1 %vm1054_vm15, %v1712_v44 }
 0x1eb   :  { %2109 = vmatprep.mubr.msk.f32.mxu1 %vm2699_vm0, %v2700_v1 }
 0x1ee   :  { %2110 = vmatmul.mubr.msk.f32.gmra.mrb[52].mxu1 %vm1054_vm15, %v1713_v18 }
 0x1ef   :  { %2179 = vmatprep.mubr.msk.f32.mxu1 %vm2699_vm0, %v2700_v1 }
 0x25b   :  { %v686_v21 = vpop.f32.mrb[6].mxu0 }
 0x25c   :  { %v3268_v62 = vadd.f32 %v3265_v19, %v686_v21  ;;  %v2030_v24 = vpop.f32.mrb[7].mxu0 }
 0x25e   :  { %v763_v25 = vand.u32 2147483647, %v3268_v62 }
 0x25f   :  { %v691_v26 = vpop.f32.mrb[8].mxu0 }
 0x260   :  { %v776_v23 = vsub.f32 0.0, %v763_v25  ;;  %v3272_v42 = vadd.f32 %v3265_v19, %v691_v26  ;;  %v2033_v58 = vpop.f32.mrb[9].mxu0 }
 0x262   :  { %v789_v27 = vmul.f32 1.442695, %v776_v23  ;;  %v764_v28 = vand.u32 2147483647, %v3272_v42 }
 0x263   :  { %v696_v30 = vpop.f32.mrb[10].mxu0 }
 0x264   :  { %v777_v10 = vsub.f32 0.0, %v764_v28  ;;  %v3276_v49 = vadd.f32 %v3265_v19, %v696_v30  ;;  %v2036_v32 = vpop.f32.mrb[11].mxu0  ;;  %2456 = vpow2.f32 %v789_v27 }
 0x266   :  { %v765_v33 = vand.u32 2147483647, %v3276_v49  ;;  %v791_v34 = vmul.f32 1.442695, %v777_v10 }
 0x267   :  { %v701_v36 = vpop.f32.mrb[12].mxu0 }
 0x268   :  { %v778_v16 = vsub.f32 0.0, %v765_v33  ;;  %v3280_v37 = vadd.f32 %v3265_v19, %v701_v36  ;;  %v2039_v38 = vpop.f32.mrb[13].mxu0  ;;  %2458 = vpow2.f32 %v791_v34 }
 0x26a   :  { %v793_v22 = vmul.f32 1.442695, %v778_v16  ;;  %v766_v40 = vand.u32 2147483647, %v3280_v37 }
 0x26b   :  { %v706_v31 = vpop.f32.mrb[14].mxu0 }
 0x26c   :  { %v779_v45 = vsub.f32 0.0, %v766_v40  ;;  %v3284_v46 = vadd.f32 %v3265_v19, %v706_v31  ;;  %v2042_v35 = vpop.f32.mrb[15].mxu0  ;;  %2460 = vpow2.f32 %v793_v22 }
 0x26d   :  { %v750_v35 = vmax.f32 %v3268_v62, 0.0 }
 0x26e   :  { %v795_v48 = vmul.f32 1.442695, %v779_v45  ;;  %v767_v20 = vand.u32 2147483647, %v3284_v46  ;;  %v3287_v51 = vpop.eup %2456 }
 0x26f   :  { %v711_v50 = vpop.f32.mrb[16].mxu0  ;;  %v815_v59 = vadd.f32 1.0, %v3287_v51  ;;  %v818_v18 = vmul.f32 -0.5, %v3287_v51  ;;  %v821_v38 = vand.u32 2147483647, %v3287_v51 }
 0x270   :  { %v780_v55 = vsub.f32 0.0, %v767_v20  ;;  %v3290_v56 = vadd.f32 %v3265_v19, %v711_v50  ;;  %v2045_v53 = vpop.f32.mrb[17].mxu0  ;;  %2462 = vpow2.f32 %v795_v48 }
 0x271   :  { %v819_v32 = vadd.f32 1.0, %v818_v18  ;;  %vm3339_vm14 = vcmp.lt.f32.partialorder %v821_v38, 0.0004427343 }
 0x272   :  { %v797_v41 = vmul.f32 1.442695, %v780_v55  ;;  %v768_v17 = vand.u32 2147483647, %v3290_v56  ;;  %v3297_v12 = vpop.eup %2458 }
 0x273   :  { %v716_v54 = vpop.f32.mrb[18].mxu0  ;;  %v824_v8 = vadd.f32 1.0, %v3297_v12  ;;  %v827_v30 = vmul.f32 -0.5, %v3297_v12  ;;  %v820_v53 = vmul.f32 %v3287_v51, %v819_v32  ;;  %v754_v32 = vmax.f32 %v3284_v46, 0.0 }
 0x274   :  { %v781_v57 = vsub.f32 0.0, %v768_v17  ;;  %v3295_v3 = vadd.f32 %v3265_v19, %v716_v54  ;;  %v2048_v4 = vpop.f32.mrb[19].mxu0  ;;  %2464 = vpow2.f32 %v797_v41  ;;  %v751_v54 = vmax.f32 %v3272_v42, 0.0 }
 0x275   :  { %2466 = vlog2.f32 %v815_v59  ;;  %v828_v48 = vadd.f32 1.0, %v827_v30 }
 0x276   :  { %v799_v60 = vmul.f32 1.442695, %v781_v57  ;;  %v769_v61 = vand.u32 2147483647, %v3295_v3  ;;  %v3300_v2 = vpop.eup %2460 }
 0x277   :  { %v721_v29 = vpop.f32.mrb[20].mxu0  ;;  %v833_v13 = vadd.f32 1.0, %v3300_v2  ;;  %v836_v20 = vmul.f32 -0.5, %v3300_v2  ;;  %v829_v42 = vmul.f32 %v3297_v12, %v828_v48 }
 0x278   :  { %v782_v43 = vsub.f32 0.0, %v769_v61  ;;  %v3303_v6 = vadd.f32 %v3265_v19, %v721_v29  ;;  %v2051_v7 = vpop.f32.mrb[21].mxu0  ;;  %2468 = vpow2.f32 %v799_v60 }
 0x279   :  { %2470 = vlog2.f32 %v824_v8  ;;  %v837_v8 = vadd.f32 1.0, %v836_v20 }
 0x27a   :  { %v801_v9 = vmul.f32 1.442695, %v782_v43  ;;  %v770_v11 = vand.u32 2147483647, %v3303_v6  ;;  %v3308_v5 = vpop.eup %2462  ;;  %v830_v43 = vand.u32 2147483647, %v3297_v12 }
 0x27b   :  { %v726_v63 = vpop.f32.mrb[22].mxu0  ;;  %v842_v21 = vadd.f32 1.0, %v3308_v5 }
 0x27c   :  { %v783_v14 = vsub.f32 0.0, %v770_v11  ;;  %v3311_v39 = vadd.f32 %v3265_v19, %v726_v63  ;;  %v2054_v15 = vpop.f32.mrb[23].mxu0  ;;  %2472 = vpow2.f32 %v801_v9  ;;  %v839_v9 = vand.u32 2147483647, %v3300_v2 }
 0x27d   :  { %2474 = vlog2.f32 %v833_v13  ;;  %v845_v13 = vmul.f32 -0.5, %v3308_v5  ;;  %vm3358_vm15 = vcmp.lt.f32.partialorder %v830_v43, 0.0004427343 }
 0x27e   :  { %v771_v44 = vand.u32 2147483647, %v3311_v39  ;;  %v3316_v24 = vpop.eup %2464  ;;  %v803_v25 = vmul.f32 1.442695, %v783_v14  ;;  %2476 = vlog2.f32 %v842_v21  ;;  %vm3367_vm1 = vcmp.lt.f32.partialorder %v839_v9, 0.0004427343 }
 0x27f   :  { %v731_v26 = vpop.f32.mrb[24].mxu0  ;;  %v2467_v28 = vpop.eup %2466  ;;  %v851_v33 = vadd.f32 1.0, %v3316_v24 }
 0x280   :  { %v784_v23 = vsub.f32 0.0, %v771_v44  ;;  %v3319_v58 = vadd.f32 %v3265_v19, %v731_v26  ;;  %v2057_v27 = vpop.f32.mrb[25].mxu0  ;;  %2478 = vpow2.f32 %v803_v25  ;;  %v817_v45 = vmul.f32 0.6931472, %v2467_v28 }
 0x281   :  { %2480 = vlog2.f32 %v851_v33  ;;  %v752_v25 = vmax.f32 %v3276_v49, 0.0  ;;  %v854_v49 = vmul.f32 -0.5, %v3316_v24  ;;  %v846_v33 = vadd.f32 1.0, %v845_v13 }
 0x282   :  { %v772_v10 = vand.u32 2147483647, %v3319_v58  ;;  %v3324_v34 = vpop.eup %2468  ;;  %v805_v36 = vmul.f32 1.442695, %v784_v23  ;;  %v823_v29 = vsel %vm3339_vm14, %v820_v53, %v817_v45 }
 0x283   :  { %v736_v16 = vpop.f32.mrb[26].mxu0  ;;  %v2471_v50 = vpop.eup %2470  ;;  %v860_v41 = vadd.f32 1.0, %v3324_v34  ;;  %v932_v44 = vadd.f32 %v823_v29, %v750_v35  ;;  %v855_v53 = vadd.f32 1.0, %v854_v49 }
 0x284   :  { %v785_v22 = vsub.f32 0.0, %v772_v10  ;;  %v3328_v40 = vadd.f32 %v3265_v19, %v736_v16  ;;  %v2060_v31 = vpop.f32.mrb[27].mxu0  ;;  %2482 = vpow2.f32 %v805_v36  ;;  %v826_v7 = vmul.f32 0.6931472, %v2471_v50 }
 0x285   :  { %2484 = vlog2.f32 %v860_v41  ;;  %v838_v10 = vmul.f32 %v3300_v2, %v837_v8  ;;  %v848_v36 = vand.u32 2147483647, %v3308_v5  ;;  %v1688_v38 = vadd.f32 -0.6931472, %v932_v44 }
 0x286   :  { %v773_v55 = vand.u32 2147483647, %v3328_v40  ;;  %v3336_v17 = vpop.eup %2472  ;;  %v807_v59 = vmul.f32 1.442695, %v785_v22  ;;  %v832_v30 = vsel %vm3358_vm15, %v829_v42, %v826_v7  ;;  %v857_v41 = vand.u32 2147483647, %v3316_v24 }
 0x287   :  { %v741_v62 = vpop.f32.mrb[28].mxu0  ;;  %v2475_v4 = vpop.eup %2474  ;;  %v869_v63 = vadd.f32 1.0, %v3336_v17  ;;  %v933_v45 = vadd.f32 %v832_v30, %v751_v54  ;;  %v863_v54 = vmul.f32 -0.5, %v3324_v34  ;;  %vm3387_vm2 = vcmp.lt.f32.partialorder %v848_v36, 0.0004427343 }
 0x288   :  { %v786_v60 = vsub.f32 0.0, %v773_v55  ;;  %v3344_v51 = vadd.f32 %v3265_v19, %v741_v62  ;;  %v2063_v61 = vpop.f32.mrb[29].mxu0  ;;  %2486 = vpow2.f32 %v807_v59  ;;  %v835_v18 = vmul.f32 0.6931472, %v2475_v4  ;;  %v2477_v21 = vpop.eup %2476 }
 0x289   :  { %2488 = vlog2.f32 %v869_v63  ;;  %v844_v35 = vmul.f32 0.6931472, %v2477_v21  ;;  %v3382_v55 = vsel %vm1237_vm13, 1.0, %v2700_v1  ;;  %v847_v4 = vmul.f32 %v3308_v5, %v846_v33 }
 0x28a   :  { %v774_v11 = vand.u32 2147483647, %v3344_v51  ;;  %v809_v14 = vmul.f32 1.442695, %v786_v60  ;;  %v3362_v28 = vpop.eup %2478  ;;  %v841_v22 = vsel %vm3367_vm1, %v838_v10, %v835_v18  ;;  %v1689_v43 = vadd.f32 -0.6931472, %v933_v45 }
 0x28b   :  { %v746_v15 = vpop.f32.mrb[26].mxu1  ;;  %v2481_v31 = vpop.eup %2480  ;;  %v878_v48 = vadd.f32 1.0, %v3362_v28  ;;  %v934_v57 = vadd.f32 %v841_v22, %v752_v25  ;;  %v850_v7 = vsel %vm3387_vm2, %v847_v4, %v844_v35  ;;  %v753_v5 = vmax.f32 %v3280_v37, 0.0 }
 0x28c   :  { %v787_v26 = vsub.f32 0.0, %v774_v11  ;;  %v3356_v12 = vadd.f32 %v3265_v19, %v746_v15  ;;  %v2066_v23 = vpop.f32.mrb[27].mxu1  ;;  %2490 = vpow2.f32 %v809_v14  ;;  %v853_v29 = vmul.f32 0.6931472, %v2481_v31 }
 0x28d   :  { %v856_v11 = vmul.f32 %v3316_v24, %v855_v53  ;;  %vm3398_vm3 = vcmp.lt.f32.partialorder %v857_v41, 0.0004427343  ;;  %v872_v63 = vmul.f32 -0.5, %v3336_v17  ;;  %v1690_v44 = vadd.f32 -0.6931472, %v934_v57 }
 0x28e   :  { %v775_v19 = vand.u32 2147483647, %v3356_v12  ;;  %v811_v16 = vmul.f32 1.442695, %v787_v26  ;;  %v3377_v20 = vpop.eup %2482  ;;  %v864_v18 = vadd.f32 1.0, %v863_v54  ;;  %v935_v25 = vadd.f32 %v850_v7, %v753_v5 }
 0x28f   :  { %v2485_v52 = vpop.eup %2484  ;;  %v887_v42 = vadd.f32 1.0, %v3377_v20  ;;  %v866_v21 = vand.u32 2147483647, %v3324_v34  ;;  %v859_v37 = vsel %vm3398_vm3, %v856_v11, %v853_v29  ;;  %v875_v22 = vand.u32 2147483647, %v3336_v17 }
 0x290   :  { %v788_v2 = vsub.f32 0.0, %v775_v19  ;;  %2492 = vpow2.f32 %v811_v16  ;;  %v862_v26 = vmul.f32 0.6931472, %v2485_v52  ;;  %v873_v19 = vadd.f32 1.0, %v872_v63 }
 0x291   :  { %v1160_v50 = vpop.f32.mrb[28].mxu1  ;;  %2494 = vlog2.f32 %v878_v48  ;;  %v936_v31 = vadd.f32 %v859_v37, %v754_v32  ;;  %vm3414_vm4 = vcmp.lt.f32.partialorder %v866_v21, 0.0004427343  ;;  %v881_v35 = vmul.f32 -0.5, %v3362_v28 }
 0x292   :  { %v1224_v59 = vmul.f32 %v1688_v38, %v1160_v50  ;;  %v2075_v62 = vpop.f32.mrb[29].mxu1  ;;  %v813_v60 = vmul.f32 1.442695, %v788_v2  ;;  %v3394_v8 = vpop.eup %2486  ;;  %v865_v38 = vmul.f32 %v3324_v34, %v864_v18  ;;  %v1691_v48 = vadd.f32 -0.6931472, %v935_v25 }
 0x293   :  { %v2489_v23 = vpop.eup %2488  ;;  %v896_v30 = vadd.f32 1.0, %v3394_v8  ;;  %v755_v34 = vmax.f32 %v3290_v56, 0.0  ;;  %vm3427_vm5 = vcmp.lt.f32.partialorder %v875_v22, 0.0004427343  ;;  %v890_v61 = vmul.f32 -0.5, %v3377_v20 }
 0x294   :  { %2496 = vpow2.f32 %v813_v60  ;;  %v1240_v24 = vadd.f32 %v3382_v55, %v1224_v59  ;;  %v871_v45 = vmul.f32 0.6931472, %v2489_v23  ;;  %v868_v46 = vsel %vm3414_vm4, %v865_v38, %v862_v26 }
 0x295   :  { %v1165_v9 = vpop.f32.mrb[30].mxu1  ;;  %2498 = vlog2.f32 %v887_v42  ;;  %v874_v59 = vmul.f32 %v3336_v17, %v873_v19  ;;  %v884_v60 = vand.u32 2147483647, %v3362_v28  ;;  %v1692_v29 = vadd.f32 -0.6931472, %v936_v31 }
 0x296   :  { %v1225_v14 = vmul.f32 %v1689_v43, %v1165_v9  ;;  %v2078_v15 = vpop.f32.mrb[31].mxu1  ;;  %v3409_v10 = vpop.eup %2490  ;;  %2500 = vlog2.f32 %v896_v30  ;;  %v937_v52 = vadd.f32 %v868_v46, %v755_v34  ;;  %v882_v43 = vadd.f32 1.0, %v881_v35 }
 0x297   :  { %v905_v50 = vadd.f32 1.0, %v3409_v10  ;;  %v877_v56 = vsel %vm3427_vm5, %v874_v59, %v871_v45  ;;  %v756_v9 = vmax.f32 %v3295_v3, 0.0  ;;  %v891_v18 = vadd.f32 1.0, %v890_v61 }
 0x298   :  { %v1241_v27 = vadd.f32 %v3382_v55, %v1225_v14  ;;  %v893_v21 = vand.u32 2147483647, %v3377_v20  ;;  %v883_v37 = vmul.f32 %v3362_v28, %v882_v43  ;;  %v899_v26 = vmul.f32 -0.5, %v3394_v8 }
 0x299   :  { %v1170_v49 = vpop.f32.mrb[32].mxu1  ;;  %2502 = vlog2.f32 %v905_v50  ;;  %v938_v25 = vadd.f32 %v877_v56, %v756_v9  ;;  %v1693_v23 = vadd.f32 -0.6931472, %v937_v52  ;;  %vm3444_vm6 = vcmp.lt.f32.partialorder %v884_v60, 0.0004427343  ;;  %v1408_v9 = vld [vmem:[#allocation12 + $0x10] sm:$0xff] }
 0x29a   :  { %v2305_v33 = vpack.c.bf16 %v1241_v27, %v1240_v24  ;;  %v1226_v36 = vmul.f32 %v1690_v44, %v1170_v49  ;;  %v2081_v16 = vpop.f32.mrb[33].mxu1  ;;  %v3422_v53 = vpop.eup %2492  ;;  %v757_v28 = vmax.f32 %v3303_v6, 0.0  ;;  %vm3454_vm7 = vcmp.lt.f32.partialorder %v893_v21, 0.0004427343 }
 0x29b   :  { %v2495_v62 = vpop.eup %2494  ;;  %v914_v42 = vadd.f32 1.0, %v3422_v53  ;;  %v1694_v38 = vadd.f32 -0.6931472, %v938_v25  ;;  %v900_v22 = vadd.f32 1.0, %v899_v26  ;;  %v902_v31 = vand.u32 2147483647, %v3394_v8 }
 0x29c   :  { %2306 = vmatpush3.bf16.msra.mxu0 %v2305_v33  ;;  %v1242_v7 = vadd.f32 %v3382_v55, %v1226_v36  ;;  %v880_v13 = vmul.f32 0.6931472, %v2495_v62  ;;  %v892_v36 = vmul.f32 %v3377_v20, %v891_v18  ;;  %v908_v2 = vmul.f32 -0.5, %v3409_v10 }
 0x29d   :  { %v1175_v41 = vpop.f32.mrb[34].mxu1  ;;  %2307 = vmatprep.subr.bf16.mxu0 %v2698_v0  ;;  %2504 = vlog2.f32 %v914_v42  ;;  %v758_v34 = vmax.f32 %v3311_v39, 0.0  ;;  %v917_v60 = vmul.f32 -0.5, %v3422_v53  ;;  %vm3468_vm8 = vcmp.lt.f32.partialorder %v902_v31, 0.0004427343 }
 0x29e   :  { %v1227_v57 = vmul.f32 %v1691_v48, %v1175_v41  ;;  %v2084_v4 = vpop.f32.mrb[35].mxu1  ;;  %v3438_v5 = vpop.eup %2496  ;;  %v886_v30 = vsel %vm3444_vm6, %v883_v37, %v880_v13  ;;  %v909_v54 = vadd.f32 1.0, %v908_v2  ;;  %v761_v16 = vmax.f32 %v3344_v51, 0.0 }
 0x29f   :  { %v2499_v63 = vpop.eup %2498  ;;  %v923_v3 = vadd.f32 1.0, %v3438_v5  ;;  %v939_v48 = vadd.f32 %v886_v30, %v757_v28  ;;  %v901_v4 = vmul.f32 %v3394_v8, %v900_v22  ;;  %v759_v8 = vmax.f32 %v3319_v58, 0.0 }
 0x2a0   :  { %v1243_v17 = vadd.f32 %v3382_v55, %v1227_v57  ;;  %v889_v32 = vmul.f32 0.6931472, %v2499_v63  ;;  %v2501_v49 = vpop.eup %2500  ;;  %v911_v57 = vand.u32 2147483647, %v3409_v10  ;;  %v918_v13 = vadd.f32 1.0, %v917_v60 }
 0x2a1   :  { %v1180_v11 = vpop.f32.mrb[36].mxu1  ;;  %2506 = vlog2.f32 %v923_v3  ;;  %v898_v46 = vmul.f32 0.6931472, %v2501_v49  ;;  %v1695_v61 = vadd.f32 -0.6931472, %v939_v48  ;;  %vm1274_vm13 = vcmask 850944  }
 0x2a2   :  { %v2308_v14 = vpack.c.bf16 %v1243_v17, %v1242_v7  ;;  %v1228_v15 = vmul.f32 %v1692_v29, %v1180_v11  ;;  %v2087_v44 = vpop.f32.mrb[37].mxu1  ;;  %v895_v20 = vsel %vm3454_vm7, %v892_v36, %v889_v32  ;;  %vm3476_vm9 = vcmp.lt.f32.partialorder %v911_v57, 0.0004427343 }
 0x2a3   :  { %v2503_v50 = vpop.eup %2502  ;;  %v940_v29 = vadd.f32 %v895_v20, %v758_v34  ;;  %v904_v39 = vsel %vm3468_vm8, %v901_v4, %v898_v46  ;;  %v910_v11 = vmul.f32 %v3409_v10, %v909_v54  ;;  %v920_v63 = vand.u32 2147483647, %v3422_v53 }
 0x2a4   :  { %2309 = vmatpush3.bf16.msra.mxu0 %v2308_v14  ;;  %v1244_v45 = vadd.f32 %v3382_v55, %v1228_v15  ;;  %v907_v43 = vmul.f32 0.6931472, %v2503_v50  ;;  %v926_v14 = vmul.f32 -0.5, %v3438_v5  ;;  %v941_v21 = vadd.f32 %v904_v39, %v759_v8 }
 0x2a5   :  { %v1185_v27 = vpop.f32.mrb[38].mxu1  ;;  %2310 = vmatprep.subr.bf16.mxu0 %v2698_v0  ;;  %v1696_v18 = vadd.f32 -0.6931472, %v940_v29  ;;  %v929_v32 = vand.u32 2147483647, %v3438_v5  ;;  %v2702_v8 = vmov 32  }
 0x2a6   :  { %v1229_v19 = vmul.f32 %v1693_v23, %v1185_v27  ;;  %v2090_v33 = vpop.f32.mrb[39].mxu1  ;;  %v913_v25 = vsel %vm3476_vm9, %v910_v11, %v907_v43  ;;  %v760_v23 = vmax.f32 %v3328_v40, 0.0  ;;  %v919_v27 = vmul.f32 %v3422_v53, %v918_v13  ;;  %2402 = vset.pattern.permute.xlu1 %v2702_v8  ;;  %2403 = vset.pattern.permute.xlu0 %v2702_v8  ;;  %v1409_v13 = vld [vmem:[#allocation12 + $0x18] sm:$0xff] }
 0x2a7   :  { %v2505_v7 = vpop.eup %2504  ;;  %v927_v30 = vadd.f32 1.0, %v926_v14  ;;  %v1697_v49 = vadd.f32 -0.6931472, %v941_v21  ;;  %vm921_vm10 = vcmp.lt.f32.partialorder %v920_v63, 0.0004427343  ;;  %v2326_v63 = vpack.c.bf16 %v1409_v13, %v1408_v9  ;;  %v1410_v14 = vld [vmem:[#allocation12 + $0x20] sm:$0xff] }
 0x2a8   :  { %v1245_v35 = vadd.f32 %v3382_v55, %v1229_v19  ;;  %v916_v37 = vmul.f32 0.6931472, %v2505_v7  ;;  %v942_v28 = vadd.f32 %v913_v25, %v760_v23  ;;  %vm930_vm11 = vcmp.lt.f32.partialorder %v929_v32, 0.0004427343  ;;  %v1413_v21 = vld [vmem:[#allocation12 + $0x38] sm:$0xff]  ;;  %v1414_v25 = vld [vmem:[#allocation12 + $0x40] sm:$0xff] }
 0x2a9   :  { %v1190_v6 = vpop.f32.mrb[40].mxu1  ;;  %v928_v22 = vmul.f32 %v3438_v5, %v927_v30  ;;  %v1416_v23 = vld [vmem:[#allocation12 + $0x50] sm:$0xff]  ;;  %v1565_v8 = vld [vmem:[#allocation13 + $0x58] sm:$0xff]  ;;  %v1567_v9 = vld [vmem:[#allocation13 + $0x68] sm:$0xff] }
 0x2aa   :  { %v2311_v41 = vpack.c.bf16 %v1245_v35, %v1244_v45  ;;  %v1230_v59 = vmul.f32 %v1694_v38, %v1190_v6  ;;  %v2093_v62 = vpop.f32.mrb[41].mxu1  ;;  %v922_v33 = vsel %vm921_vm10, %v919_v27, %v916_v37  ;;  %v1698_v2 = vadd.f32 -0.6931472, %v942_v28  ;;  %v1415_v37 = vld [vmem:[#allocation12 + $0x48] sm:$0xff]  ;;  %v1420_v32 = vld [vmem:[#allocation12 + $0x70] sm:$0xff] }
 0x2ab   :  { %v2507_v26 = vpop.eup %2506  ;;  %v943_v45 = vadd.f32 %v922_v33, %v761_v16  ;;  %v762_v6 = vmax.f32 %v3356_v12, 0.0  ;;  %v1254_v62 = vshrl.u32 %v958_v47, 7  ;;  %v1728_v12 = vld [vmem:[%s3559_s1] ss:$0 sm:$0xff]  ;;  %v1419_v27 = vld [vmem:[#allocation12 + $0x68] sm:$0xff]  ;;  %v1568_v13 = vld [vmem:[#allocation13 + $0x70] sm:$0xff] }
 0x2ac   :  { %2312 = vmatpush3.bf16.msra.mxu0 %v2311_v41  ;;  %v1246_v15 = vadd.f32 %v3382_v55, %v1230_v59  ;;  %v925_v36 = vmul.f32 0.6931472, %v2507_v26  ;;  %v2335_v26 = vpack.c.bf16 %v1415_v37, %v1414_v25 }
 0x2ad   :  { %v1195_v56 = vpop.f32.mrb[42].mxu1  ;;  %2313 = vmatprep.subr.bf16.mxu0 %v2698_v0  ;;  %v1699_v51 = vadd.f32 -0.6931472, %v943_v45  ;;  %vm1262_vm12 = vcmp.eq.s32.totalorder %v1254_v62, %v1728_v12  ;;  %v1256_v43 = vadd.s32 16, %v1254_v62 }
 0x2ae   :  { %v1231_v17 = vmul.f32 %v1695_v61, %v1195_v56  ;;  %v2096_v42 = vpop.f32.mrb[43].mxu1  ;;  %v931_v48 = vsel %vm930_vm11, %v928_v22, %v925_v36  ;;  %v1255_v56 = vadd.s32 8, %v1254_v62  ;;  %v1729_v39 = vsel %vm1262_vm12, 1.0, %v2700_v1  ;;  %v1555_v62 = vld [vmem:[#allocation13 + $0x8] sm:$0xff] }
 0x2af   :  { %v944_v34 = vadd.f32 %v931_v48, %v762_v6  ;;  %vm1264_vm15 = vcmp.eq.s32.totalorder %v1256_v43, %v1728_v12  ;;  %v1407_v42 = vld [vmem:[#allocation12 + $0x8] sm:$0xff] }
 0x2b0   :  { %v1247_v44 = vadd.f32 %v3382_v55, %v1231_v17  ;;  %vm1263_vm14 = vcmp.eq.s32.totalorder %v1255_v56, %v1728_v12  ;;  %v1406_v17 = vld [vmem:[#allocation12] sm:$0xff]  ;;  %v1561_v56 = vld [vmem:[#allocation13 + $0x38] sm:$0xff]  ;;  %v1563_v43 = vld [vmem:[#allocation13 + $0x48] sm:$0xff] }
 0x2b1   :  { %v1200_v58 = vpop.f32.mrb[44].mxu1  ;;  %v1700_v54 = vadd.f32 -0.6931472, %v944_v34  ;;  %v1730_v7 = vsel %vm1263_vm14, 1.0, %v2700_v1  ;;  %v2323_v11 = vpack.c.bf16 %v1407_v42, %v1406_v17  ;;  %v1566_v42 = vld [vmem:[#allocation13 + $0x60] sm:$0xff] }
 0x2b2   :  { %v2314_v10 = vpack.c.bf16 %v1247_v44, %v1246_v15  ;;  %v1232_v24 = vmul.f32 %v1696_v18, %v1200_v58  ;;  %v2099_v3 = vpop.f32.mrb[45].mxu1  ;;  %v1411_v15 = vld [vmem:[#allocation12 + $0x28] sm:$0xff]  ;;  %v1412_v18 = vld [vmem:[#allocation12 + $0x30] sm:$0xff] }
 0x2b3   :  { %2324 = vmatpush3.bf16.msra.mxu1 %v2323_v11  ;;  %v2329_v44 = vpack.c.bf16 %v1411_v15, %v1410_v14  ;;  %v2332_v58 = vpack.c.bf16 %v1413_v21, %v1412_v18  ;;  %v1418_v3 = vld [vmem:[#allocation12 + $0x60] sm:$0xff]  ;;  %v2365_v11 = vpack.c.bf16 %v1567_v9, %v1566_v42 }
 0x2b4   :  { %2315 = vmatpush3.bf16.msra.mxu0 %v2314_v10  ;;  %v1248_v53 = vadd.f32 %v3382_v55, %v1232_v24  ;;  %2325 = vmatprep.subr.bf16.mxu1 %v2698_v0  ;;  %v1417_v10 = vld [vmem:[#allocation12 + $0x58] sm:$0xff]  ;;  %v2341_v30 = vpack.c.bf16 %v1419_v27, %v1418_v3  ;;  %v1735_v15 = vld [vmem:[%s3568_s10] ss:$0 sm:$0xff] }
 0x2b5   :  { %v1205_v19 = vpop.f32.mrb[46].mxu1  ;;  %2316 = vmatprep.subr.bf16.mxu0 %v2698_v0  ;;  %v2338_v24 = vpack.c.bf16 %v1417_v10, %v1416_v23 }
 0x2b6   :  { %v1233_v40 = vmul.f32 %v1697_v49, %v1205_v19  ;;  %v2102_v38 = vpop.f32.mrb[47].mxu1  ;;  %v1421_v49 = vld [vmem:[#allocation12 + $0x78] sm:$0xff] }
 0x2b7   :  { %2327 = vmatpush3.bf16.msra.mxu1 %v2326_v63  ;;  %v2344_v28 = vpack.c.bf16 %v1421_v49, %v1420_v32  ;;  %v1569_v63 = vld [vmem:[#allocation13 + $0x78] sm:$0xff] }
 0x2b8   :  { %v1249_v31 = vadd.f32 %v3382_v55, %v1233_v40  ;;  %2328 = vmatprep.subr.bf16.mxu1 %v2698_v0  ;;  %v2368_v14 = vpack.c.bf16 %v1569_v63, %v1568_v13 }
 0x2b9   :  { %v1210_v35 = vpop.f32.mrb[48].mxu1 }
 0x2ba   :  { %v2317_v20 = vpack.c.bf16 %v1249_v31, %v1248_v53  ;;  %v1234_v46 = vmul.f32 %v1698_v2, %v1210_v35  ;;  %v2105_v50 = vpop.f32.mrb[49].mxu1 }
 0x2bb   :  { %2330 = vmatpush3.bf16.msra.mxu1 %v2329_v44 }
 0x2bc   :  { %2318 = vmatpush3.bf16.msra.mxu0 %v2317_v20  ;;  %v1250_v57 = vadd.f32 %v3382_v55, %v1234_v46  ;;  %2331 = vmatprep.subr.bf16.mxu1 %v2698_v0 }
 0x2bd   :  { %v1215_v41 = vpop.f32.mrb[50].mxu1  ;;  %2319 = vmatprep.subr.bf16.mxu0 %v2698_v0 }
 0x2be   :  { %v1235_v5 = vmul.f32 %v1699_v51, %v1215_v41  ;;  %v2108_v59 = vpop.f32.mrb[51].mxu1 }
 0x2bf   :  { %2333 = vmatpush3.bf16.msra.mxu1 %v2332_v58  ;;  %v1554_v59 = vld [vmem:[#allocation13] sm:$0xff] }
 0x2c0   :  { %v1251_v4 = vadd.f32 %v3382_v55, %v1235_v5  ;;  %2334 = vmatprep.subr.bf16.mxu1 %v2698_v0 }
 0x2c1   :  { %v1220_v60 = vpop.f32.mrb[52].mxu1 }
 0x2c2   :  { %v2320_v61 = vpack.c.bf16 %v1251_v4, %v1250_v57  ;;  %v1236_v29 = vmul.f32 %v1700_v54, %v1220_v60  ;;  %v2111_v52 = vpop.f32.mrb[53].mxu1  ;;  %v2347_v57 = vpack.c.bf16 %v1555_v62, %v1554_v59  ;;  %v1556_v4 = vld [vmem:[#allocation13 + $0x10] sm:$0xff]  ;;  %v1557_v54 = vld [vmem:[#allocation13 + $0x18] sm:$0xff]  ;;  %v1558_v60 = vld [vmem:[#allocation13 + $0x20] sm:$0xff] }
 0x2c3   :  { %2336 = vmatpush3.bf16.msra.mxu1 %v2335_v26  ;;  %v2350_v12 = vpack.c.bf16 %v1557_v54, %v1556_v4  ;;  %v1560_v52 = vld [vmem:[#allocation13 + $0x30] sm:$0xff] }
 0x2c4   :  { %2321 = vmatpush3.bf16.msra.mxu0 %v2320_v61  ;;  %v1252_v47 = vadd.f32 %v3382_v55, %v1236_v29  ;;  %v1731_v55 = vsel %vm1264_vm15, 1.0, %v2700_v1  ;;  %2337 = vmatprep.subr.bf16.mxu1 %v2698_v0  ;;  %v1559_v61 = vld [vmem:[#allocation13 + $0x28] sm:$0xff] }
 0x2c5   :  { %2136 = vmatprep.subr.mxu0 %v2700_v1  ;;  %v2353_v29 = vpack.c.bf16 %v1559_v61, %v1558_v60 }
 0x2c7   :  { %2339 = vmatpush3.bf16.msra.mxu1 %v2338_v24 }
 0x2c8   :  { %2137 = vmatpush3.msra.mxu0 %v1252_v47  ;;  %2340 = vmatprep.subr.bf16.mxu1 %v2698_v0  ;;  %v2356_v47 = vpack.c.bf16 %v1561_v56, %v1560_v52 }
 0x2c9   :  { %2139 = vmatmul.mubr.msk.f32.vlgmr.msra.gmra.mrb[30].mxu0 %vm1274_vm13, %v1729_v39  ;;  %2346 = vmatprep.subr.bf16.mxu0 %v2698_v0  ;;  %v1562_v39 = vld [vmem:[#allocation13 + $0x40] sm:$0xff] }
 0x2ca   :  { %2141 = vmatprep.mubr.msk.f32.mxu0 %vm2699_vm0, %v2700_v1  ;;  %2348 = vmatpush3.bf16.msra.mxu0 %v2347_v57 }
 0x2cb   :  { %2342 = vmatpush3.bf16.msra.mxu1 %v2341_v30  ;;  %2349 = vmatprep.subr.bf16.mxu0 %v2698_v0 }
 0x2cc   :  { %2343 = vmatprep.subr.bf16.mxu1 %v2698_v0 }
 0x2cd   :  { %2142 = vmatmul.mubr.msk.f32.gmra.mrb[32].mxu0 %vm1274_vm13, %v1730_v7  ;;  %v2359_v7 = vpack.c.bf16 %v1563_v43, %v1562_v39  ;;  %v1736_v43 = vld [vmem:[%s3570_s12] ss:$0 sm:$0xff]  ;;  %s2658_s12 = scalar_lea.vmem %s1672_s29, 384 }
 0x2ce   :  { %2144 = vmatprep.mubr.msk.f32.mxu0 %vm2699_vm0, %v2700_v1  ;;  %2351 = vmatpush3.bf16.msra.mxu0 %v2350_v12  ;;  %p2659_p6 = scmp.ne.s32.totalorder %s1672_s29, %s2658_s12  ;;  %p2664_p8 = scmp.lt.s32.totalorder %s2658_s12, %s2658_s12 }
 0x2cf   :  { %2345 = vmatpush3.bf16.msra.mxu1 %v2344_v28  ;;  %2352 = vmatprep.subr.bf16.mxu0 %v2698_v0 }
 0x2d0   :  { %p2665_p9 = por %p2664_p8, %p2663_p7 }
 0x2d1   :  { %2145 = vmatmul.mubr.msk.f32.gmra.mrb[34].mxu0 %vm1274_vm13, %v1731_v55  ;;  %v1564_v55 = vld [vmem:[#allocation13 + $0x50] sm:$0xff] }
 0x2d2   :  { %2220 = vmatprep.mubr.msk.f32.mxu0 %vm2699_vm0, %v2700_v1  ;;  %2354 = vmatpush3.bf16.msra.mxu0 %v2353_v29  ;;  %v2362_v17 = vpack.c.bf16 %v1565_v8, %v1564_v55  ;;  %v1657_v55 = vld [vmem:[#allocation4] sm:$0xff]  ;;  %p2666_p10 = pnand %p2665_p9, %p2659_p6 }
 0x2d3   :  { %2355 = vmatprep.subr.bf16.mxu0 %v2698_v0 }
 0x2d6   :  { %2357 = vmatpush3.bf16.msra.mxu0 %v2356_v47 }
 0x2d7   :  { %2358 = vmatprep.subr.bf16.mxu0 %v2698_v0 }
 0x2da   :  { %2360 = vmatpush3.bf16.msra.mxu0 %v2359_v7 }
 0x2db   :  { %2361 = vmatprep.subr.bf16.mxu0 %v2698_v0 }
 0x2de   :  { %2363 = vmatpush3.bf16.msra.mxu0 %v2362_v17 }
 0x2df   :  { %2364 = vmatprep.subr.bf16.mxu0 %v2698_v0 }
 0x2e2   :  { %2366 = vmatpush3.bf16.msra.mxu0 %v2365_v11  ;;  %v1658_v11 = vld [vmem:[#allocation4 + $0x8] sm:$0xff] }
 0x2e3   :  { %2367 = vmatprep.subr.bf16.mxu0 %v2698_v0 }
 0x2e6   :  { %2369 = vmatpush3.bf16.msra.mxu0 %v2368_v14 }
 0x39c   :  { %v1350_v19 = vpop.f32.mrb[30].mxu0 }
 0x39d   :  { %v1379_v33 = vmax.f32 %v1350_v19, 1.0  ;;  %v2140_v36 = vpop.f32.mrb[31].mxu0  ;;  %vm1376_vm1 = vcmp.gt.f32.partialorder %v1350_v19, 0.0 }
 0x39f   :  { %2508 = vrcp.f32 %v1379_v33 }
 0x3a0   :  { %v1355_v16 = vpop.f32.mrb[32].mxu0 }
 0x3a1   :  { %v1380_v40 = vmax.f32 %v1355_v16, 1.0  ;;  %v2143_v38 = vpop.f32.mrb[33].mxu0  ;;  %vm1377_vm2 = vcmp.gt.f32.partialorder %v1355_v16, 0.0 }
 0x3a3   :  { %2510 = vrcp.f32 %v1380_v40 }
 0x3a4   :  { %v1360_v22 = vpop.f32.mrb[34].mxu0 }
 0x3a5   :  { %v1381_v53 = vmax.f32 %v1360_v22, 1.0  ;;  %v2146_v31 = vpop.f32.mrb[35].mxu0  ;;  %vm1378_vm3 = vcmp.gt.f32.partialorder %v1360_v22, 0.0 }
 0x3a7   :  { %2512 = vrcp.f32 %v1381_v53 }
 0x3a9   :  { %v2509_v2 = vpop.eup %2508 }
 0x3aa   :  { %v1385_v45 = vsel %vm1376_vm1, %v2509_v2, 0.0 }
 0x3ab   :  { %1390 = vperm.xlu1 %2402, %v1385_v45  }
 0x3ad   :  { %v2511_v35 = vpop.eup %2510 }
 0x3ae   :  { %v1386_v48 = vsel %vm1377_vm2, %v2511_v35, 0.0 }
 0x3af   :  { %1395 = vperm.xlu0 %2403, %v1386_v48  }
 0x3b1   :  { %v2513_v6 = vpop.eup %2512 }
 0x3b2   :  { %v1387_v20 = vsel %vm1378_vm3, %v2513_v6, 0.0 }
 0x3b3   :  { %1400 = vperm.xlu1 %2402, %v1387_v20  }
 0x42a   :  { %v1391_v46 = vpop.permute.xlu1 %1390 }
 0x42b   :  { %v1403_v50 = vmul.f32 %v1391_v46, %v1350_v19 }
 0x42d   :  { %2180 = vmatmul.mubr.f32.vlgmr.msra.gmra.mrb[54].mxu1 %v1403_v50 }
 0x42e   :  { %v1396_v51 = vpop.permute.xlu0 %1395  ;;  %2182 = vmatprep.mubr.msk.f32.mxu1 %vm2699_vm0, %v2700_v1 }
 0x42f   :  { %v1404_v34 = vmul.f32 %v1396_v51, %v1355_v16 }
 0x431   :  { %2183 = vmatmul.mubr.f32.gmra.mrb[56].mxu1 %v1404_v34 }
 0x432   :  { %v1401_v41 = vpop.permute.xlu1 %1400  ;;  %2185 = vmatprep.mubr.msk.f32.mxu1 %vm2699_vm0, %v2700_v1 }
 0x433   :  { %v1405_v5 = vmul.f32 %v1401_v41, %v1360_v22 }
 0x435   :  { %2186 = vmatmul.mubr.f32.gmra.mrb[58].mxu1 %v1405_v5 }
 0x500   :  { %v1495_v44 = vpop.f32.mrb[54].mxu1 }
 0x501   :  { %v1496_v18 = vadd.f32 %v1735_v15, %v1495_v44  ;;  %v2181_v21 = vpop.f32.mrb[55].mxu1 }
 0x503   :  { %v1512_v58 = vand.u32 2147483647, %v1496_v18  ;;  %v1509_v50 = vmax.f32 %v1496_v18, 0.0 }
 0x504   :  { %v1500_v25 = vpop.f32.mrb[56].mxu1 }
 0x505   :  { %v1515_v37 = vsub.f32 0.0, %v1512_v58  ;;  %v1501_v26 = vadd.f32 %v1735_v15, %v1500_v25  ;;  %v2184_v23 = vpop.f32.mrb[57].mxu1 }
 0x507   :  { %v1518_v10 = vmul.f32 1.442695, %v1515_v37  ;;  %v1513_v24 = vand.u32 2147483647, %v1501_v26  ;;  %v1510_v4 = vmax.f32 %v1501_v26, 0.0 }
 0x508   :  { %v1505_v3 = vpop.f32.mrb[58].mxu1 }
 0x509   :  { %2514 = vpow2.f32 %v1518_v10  ;;  %v1516_v0 = vsub.f32 0.0, %v1513_v24  ;;  %v1506_v27 = vadd.f32 %v1735_v15, %v1505_v3  ;;  %v2187_v30 = vpop.f32.mrb[59].mxu1 }
 0x50b   :  { %v1520_v32 = vmul.f32 1.442695, %v1516_v0  ;;  %v1514_v49 = vand.u32 2147483647, %v1506_v27  ;;  %v1511_v56 = vmax.f32 %v1506_v27, 0.0 }
 0x50d   :  { %2516 = vpow2.f32 %v1520_v32  ;;  %v1517_v28 = vsub.f32 0.0, %v1514_v49 }
 0x50f   :  { %v1522_v19 = vmul.f32 1.442695, %v1517_v28 }
 0x511   :  { %2518 = vpow2.f32 %v1522_v19 }
 0x513   :  { %v2515_v33 = vpop.eup %2514 }
 0x514   :  { %v1524_v36 = vadd.f32 1.0, %v2515_v33  ;;  %v1527_v38 = vmul.f32 -0.5, %v2515_v33  ;;  %v1530_v45 = vand.u32 2147483647, %v2515_v33 }
 0x516   :  { %2520 = vlog2.f32 %v1524_v36  ;;  %v1528_v31 = vadd.f32 1.0, %v1527_v38  ;;  %vm1531_vm4 = vcmp.lt.f32.partialorder %v1530_v45, 0.0004427343 }
 0x517   :  { %v2517_v16 = vpop.eup %2516 }
 0x518   :  { %v1533_v40 = vadd.f32 1.0, %v2517_v16  ;;  %v1536_v2 = vmul.f32 -0.5, %v2517_v16  ;;  %v1529_v6 = vmul.f32 %v2515_v33, %v1528_v31  ;;  %v1539_v51 = vand.u32 2147483647, %v2517_v16 }
 0x51a   :  { %2522 = vlog2.f32 %v1533_v40  ;;  %v1537_v20 = vadd.f32 1.0, %v1536_v2  ;;  %vm1540_vm5 = vcmp.lt.f32.partialorder %v1539_v51, 0.0004427343 }
 0x51b   :  { %v2519_v22 = vpop.eup %2518 }
 0x51c   :  { %v1542_v53 = vadd.f32 1.0, %v2519_v22  ;;  %v1545_v46 = vmul.f32 -0.5, %v2519_v22  ;;  %v1538_v62 = vmul.f32 %v2517_v16, %v1537_v20  ;;  %v1548_v54 = vand.u32 2147483647, %v2519_v22 }
 0x51e   :  { %2524 = vlog2.f32 %v1542_v53  ;;  %v1546_v57 = vadd.f32 1.0, %v1545_v46  ;;  %vm1549_vm6 = vcmp.lt.f32.partialorder %v1548_v54, 0.0004427343 }
 0x520   :  { %v2521_v35 = vpop.eup %2520  ;;  %v1547_v52 = vmul.f32 %v2519_v22, %v1546_v57 }
 0x521   :  { %v1526_v48 = vmul.f32 0.6931472, %v2521_v35 }
 0x523   :  { %v1532_v34 = vsel %vm1531_vm4, %v1529_v6, %v1526_v48 }
 0x524   :  { %v2523_v41 = vpop.eup %2522  ;;  %v1551_v5 = vadd.f32 %v1532_v34, %v1509_v50 }
 0x525   :  { %v1535_v59 = vmul.f32 0.6931472, %v2523_v41 }
 0x526   :  { %2221 = vmatmul.mubr.f32.vlgmr.msra.gmra.mrb[36].mxu0 %v1551_v5 }
 0x527   :  { %2223 = vmatprep.mubr.msk.f32.mxu0 %vm2699_vm0, %v2700_v1  ;;  %v1541_v12 = vsel %vm1540_vm5, %v1538_v62, %v1535_v59 }
 0x528   :  { %v2525_v60 = vpop.eup %2524  ;;  %v1552_v61 = vadd.f32 %v1541_v12, %v1510_v4 }
 0x529   :  { %v1544_v29 = vmul.f32 0.6931472, %v2525_v60 }
 0x52a   :  { %2224 = vmatmul.mubr.f32.gmra.mrb[38].mxu0 %v1552_v61 }
 0x52b   :  { %2226 = vmatprep.mubr.msk.f32.mxu0 %vm2699_vm0, %v2700_v1  ;;  %v1550_v47 = vsel %vm1549_vm6, %v1547_v52, %v1544_v29  ;;  %v1659_v1 = vld [vmem:[#allocation4 + $0x10] sm:$0xff] }
 0x52c   :  { %v1553_v39 = vadd.f32 %v1550_v47, %v1511_v56 }
 0x52e   :  { %2227 = vmatmul.mubr.f32.gmra.mrb[40].mxu0 %v1553_v39 }
 0x5f9   :  { %v1643_v7 = vpop.f32.mrb[36].mxu0 }
 0x5fa   :  { %v1644_v8 = vadd.f32 %v1736_v43, %v1643_v7  ;;  %v2222_v17 = vpop.f32.mrb[37].mxu0 }
 0x5fc   :  { %v1660_v42 = vadd.f32 %v1657_v55, %v1644_v8 }
 0x5fd   :  { %v1648_v9 = vpop.f32.mrb[38].mxu0 }
 0x5fe   :  { %1663 = vst [vmem:[#allocation15] sm:$0xff] %v1660_v42  ;;  %v1649_v13 = vadd.f32 %v1736_v43, %v1648_v9  ;;  %v2225_v63 = vpop.f32.mrb[39].mxu0 }
 0x600   :  { %v1661_v14 = vadd.f32 %v1658_v11, %v1649_v13 }
 0x601   :  { %v1653_v15 = vpop.f32.mrb[40].mxu0 }
 0x602   :  { %1664 = vst [vmem:[#allocation15 + $0x8] sm:$0xff] %v1661_v14  ;;  %v1654_v44 = vadd.f32 %v1736_v43, %v1653_v15  ;;  %v2228_v18 = vpop.f32.mrb[41].mxu0 }
 0x604   :  { %v1662_v21 = vadd.f32 %v1659_v1, %v1654_v44 }
 0x606   :  { %1665 = vst [vmem:[#allocation15 + $0x10] sm:$0xff] %v1662_v21 }
 0x607   :  { %2669 = shalt.err (!%p2666_p10)
}
 0x608   :  { %s2670_s28 = scalar_lea.hbm %s3571_s13, 384 }
 0x609   :  { %p2671_p11 = scmp.ne.s32.totalorder %s3571_s13, %s2670_s28  ;;  %p2674_p12 = scmp.lt.u32.totalorder %s2670_s28, %s3571_s13 }
 0x60b   :  { %p2676_p13 = pnand %p2674_p12, %p2671_p11 }
 0x60d   :  { %2679 = shalt.err (!%p2676_p13)
}
 0x60e   :  { %1677 = dma.vmem_to_hbm [thread:$0]  %s1672_s29, 384, %s3571_s13, [#allocation6], %s2692_s20, %s2692_s20, %s2693_s21  }
 0x60f   :  { %2688 = dma.done.wait [#allocation6], 384  }
 0x610   :  { %2689 = vsyncadd [#allocation6], 4294966912 }
 0x611   :  { %1681 = vsyncpa [#allocation5], 1 }
 0x612   :  { %1682 = vsyncpa [#allocation8], 1 }
 0x613   :  { %1683 = vsyncpa [#allocation11], 1 }
 0x614   :  { %1684 = vsyncpa [#allocation14], 1 }
 0x615   :  { %1685 = vsyncpa [#allocation6], 1 }

</bundles_post_ra>
